<compile_context>
chip_gen: v5e
topology: v5e:2x2
jax: 0.10.0
libtpu: 0.0.40
codegen_flags: <defaults>
</compile_context>

<pallas_src>
import functools
import math

import jax
import jax.numpy as jnp
from jax.experimental import pallas as pl
from jax.experimental.pallas import tpu as pltpu


# ---------------------------------------------------------------------------
# Fused kernel: one grid step = (one batch tile, one encoder layer)
# ---------------------------------------------------------------------------
def encoder_stack_kernel(x_ref, wq_ref, wk_ref, wv_ref, bq_ref, bk_ref, bv_ref,
                         wo_ref, bo_ref, ln1w_ref, ln1b_ref,
                         w1_ref, b1_ref, w2_ref, b2_ref, ln2w_ref, ln2b_ref,
                         out_ref, attn_ref, y_ref, *, nhead, eps=1e-5):
    layer = pl.program_id(1)
    num_layers = pl.num_programs(1)

    # Layer 0: load this batch tile's activations into the resident VMEM carry.
    @pl.when(layer == 0)
    def _():
        y_ref[...] = x_ref[...]

    y = y_ref[...]                                   # (Bt, S, D) float32 carry
    Bt, S, D = y.shape

    wq = wq_ref[0]                                   # (nhead, D, hd) bf16 (1/sqrt(hd) folded in)
    wk = wk_ref[0]
    wv = wv_ref[0]
    bq = bq_ref[0]                                   # (nhead, 1, hd) f32
    bk = bk_ref[0]
    bv = bv_ref[0]
    wo = wo_ref[0]                                   # (nhead, hd, D) bf16
    bo = bo_ref[0]                                   # (1, D) f32

    attn_rows = []                                   # per batch element: (S, D)
    attn_avgs = []                                   # per batch element: (S, S)
    for b in range(Bt):   # small static unroll over batch elements in the tile
        xh = jnp.broadcast_to(y[b].astype(jnp.bfloat16)[None], (nhead, S, D))
        # Per-head projections as head-batched matmuls (no transposes, no concat).
        q = (jnp.einsum('hsd,hde->hse', xh, wq,
                        preferred_element_type=jnp.float32) + bq).astype(jnp.bfloat16)
        k = (jnp.einsum('hsd,hde->hse', xh, wk,
                        preferred_element_type=jnp.float32) + bk).astype(jnp.bfloat16)
        v = (jnp.einsum('hsd,hde->hse', xh, wv,
                        preferred_element_type=jnp.float32) + bv).astype(jnp.bfloat16)
        # 1/sqrt(head_dim) is already folded into wq / bq.
        s = jnp.einsum('hqe,hke->hqk', q, k,
                       preferred_element_type=jnp.float32)           # (nhead, S, S)
        s = s - jnp.max(s, axis=-1, keepdims=True)
        p = jnp.exp(s)
        p = p * pl.reciprocal(jnp.sum(p, axis=-1, keepdims=True))    # exact f32 softmax
        attn_avgs.append(jnp.mean(p, axis=0))                        # head-averaged (S, S)
        ctx = jnp.einsum('hqk,hke->hqe', p.astype(jnp.bfloat16), v,
                         preferred_element_type=jnp.float32).astype(jnp.bfloat16)
        # Output projection as head-batched matmul + head-sum (no concat).
        oh = jnp.einsum('hse,hed->hsd', ctx, wo,
                        preferred_element_type=jnp.float32)          # (nhead, S, D)
        attn_rows.append(jnp.sum(oh, axis=0) + bo)                   # (S, D)

    attn_out = jnp.stack(attn_rows, axis=0)                          # (Bt, S, D)

    # ---- residual + LayerNorm 1 (f32), rows flattened for lane-dense FFN ----
    x1 = (y + attn_out).reshape(Bt * S, D)
    mu1 = jnp.mean(x1, axis=-1, keepdims=True)
    var1 = jnp.mean((x1 - mu1) ** 2, axis=-1, keepdims=True)
    x1n = (x1 - mu1) * jax.lax.rsqrt(var1 + eps) * ln1w_ref[0] + ln1b_ref[0]

    # ---- feed-forward: Linear -> ReLU -> Linear (bf16 matmuls, f32 accum) ----
    h1 = jnp.dot(x1n.astype(jnp.bfloat16), w1_ref[0],
                 preferred_element_type=jnp.float32) + b1_ref[0]
    h1 = jnp.maximum(h1, 0.0)
    ff = jnp.dot(h1.astype(jnp.bfloat16), w2_ref[0],
                 preferred_element_type=jnp.float32) + b2_ref[0]

    # ---- residual + LayerNorm 2 ----
    x2 = x1n + ff
    mu2 = jnp.mean(x2, axis=-1, keepdims=True)
    var2 = jnp.mean((x2 - mu2) ** 2, axis=-1, keepdims=True)
    y_new = ((x2 - mu2) * jax.lax.rsqrt(var2 + eps) * ln2w_ref[0]
             + ln2b_ref[0]).reshape(Bt, S, D)

    y_ref[...] = y_new                               # carry to next layer

    # Only the last layer's output / attention weights ever reach HBM.
    @pl.when(layer == num_layers - 1)
    def _():
        out_ref[...] = y_new
        attn_ref[...] = jnp.stack(attn_avgs, axis=0)


# ---------------------------------------------------------------------------
# Wrapper: parameter preparation (transposes, per-head layout, scale, bf16)
# ---------------------------------------------------------------------------
def init_layer_params(key, d_model, dim_feedforward):
    """PyTorch-layout parameters for one TransformerEncoderLayer."""
    ks = jax.random.split(key, 6)
    s = 0.05
    return {
        "in_proj_weight": s * jax.random.normal(ks[0], (3 * d_model, d_model), jnp.float32),
        "in_proj_bias": jnp.zeros((3 * d_model,), jnp.float32),
        "out_proj_weight": s * jax.random.normal(ks[1], (d_model, d_model), jnp.float32),
        "out_proj_bias": jnp.zeros((d_model,), jnp.float32),
        "ln1_weight": jnp.ones((d_model,), jnp.float32),
        "ln1_bias": jnp.zeros((d_model,), jnp.float32),
        "linear1_weight": s * jax.random.normal(ks[2], (dim_feedforward, d_model), jnp.float32),
        "linear1_bias": s * jax.random.normal(ks[3], (dim_feedforward,), jnp.float32),
        "linear2_weight": s * jax.random.normal(ks[4], (d_model, dim_feedforward), jnp.float32),
        "linear2_bias": s * jax.random.normal(ks[5], (d_model,), jnp.float32),
        "ln2_weight": jnp.ones((d_model,), jnp.float32),
        "ln2_bias": jnp.zeros((d_model,), jnp.float32),
    }


def prepare_kernel_params(layer_params, nhead):
    """Hoist all transposes / per-head splits / scaling out of the kernel.

    Returns a dict of per-layer-stacked arrays; matmul weights in bf16.
    """
    D = layer_params[0]["in_proj_weight"].shape[1]
    assert D % nhead == 0
    hd = D // nhead
    scale = 1.0 / math.sqrt(hd)

    cols = {k: [] for k in ("wq", "wk", "wv", "bq", "bk", "bv", "wo", "bo",
                            "ln1w", "ln1b", "w1", "b1", "w2", "b2", "ln2w", "ln2b")}
    for p in layer_params:
        wqkv = p["in_proj_weight"]            # (3D, D); q = x @ wqkv[:D].T
        bqkv = p["in_proj_bias"]              # (3D,)

        def per_head(w, b, s=1.0):
            wt = (w.T * s).reshape(D, nhead, hd).transpose(1, 0, 2)   # (nhead, D, hd)
            bt = (b * s).reshape(nhead, 1, hd)
            return wt, bt

        wq, bq = per_head(wqkv[:D], bqkv[:D], scale)        # 1/sqrt(hd) folded into Q
        wk, bk = per_head(wqkv[D:2 * D], bqkv[D:2 * D])
        wv, bv = per_head(wqkv[2 * D:], bqkv[2 * D:])
        cols["wq"].append(wq); cols["bq"].append(bq)
        cols["wk"].append(wk); cols["bk"].append(bk)
        cols["wv"].append(wv); cols["bv"].append(bv)
        # out_proj: attn_out = sum_h ctx_h @ Wo.T[h*hd:(h+1)*hd, :]
        cols["wo"].append(p["out_proj_weight"].T.reshape(nhead, hd, D))
        cols["bo"].append(p["out_proj_bias"].reshape(1, D))
        cols["ln1w"].append(p["ln1_weight"].reshape(1, D))
        cols["ln1b"].append(p["ln1_bias"].reshape(1, D))
        cols["w1"].append(p["linear1_weight"].T)            # (D, Fh)
        cols["b1"].append(p["linear1_bias"].reshape(1, -1))
        cols["w2"].append(p["linear2_weight"].T)            # (Fh, D)
        cols["b2"].append(p["linear2_bias"].reshape(1, -1))
        cols["ln2w"].append(p["ln2_weight"].reshape(1, D))
        cols["ln2b"].append(p["ln2_bias"].reshape(1, D))

    bf16_keys = {"wq", "wk", "wv", "wo", "w1", "w2"}        # MXU operands only
    out = {}
    for k, v in cols.items():
        stacked = jnp.stack(v, axis=0)
        out[k] = stacked.astype(jnp.bfloat16) if k in bf16_keys else stacked.astype(jnp.float32)
    return out


def _layer_spec(shape):
    """BlockSpec for a (num_layers, ...) stacked parameter: one layer per step."""
    zeros = (0,) * (len(shape) - 1)
    return pl.BlockSpec((1,) + tuple(shape[1:]), lambda b, l: (l,) + zeros)


def _default_batch_block(B):
    # Batch several elements per grid step when possible, but keep >= 2
    # parallel grid tiles (v7x has 2 TensorCores).
    cap = max(1, min(8, B // 2))
    for bt in range(cap, 0, -1):
        if B % bt == 0:
            return bt
    return 1


def transformer_encoder(src, kernel_params, nhead, *, batch_block=None, eps=1e-5):
    """src: (S, B, D) seq-first (PyTorch convention). Returns (output, attn_weights)."""
    S, B, D = src.shape
    x = jnp.transpose(src, (1, 0, 2))                 # (B, S, D) for the kernel
    L = kernel_params["wq"].shape[0]
    if batch_block is None:
        batch_block = _default_batch_block(B)
    assert B % batch_block == 0
    nb = B // batch_block

    kernel = functools.partial(encoder_stack_kernel, nhead=nhead, eps=eps)
    out, attn = pl.pallas_call(
        kernel,
        out_shape=(jax.ShapeDtypeStruct((B, S, D), jnp.float32),
                   jax.ShapeDtypeStruct((B, S, S), jnp.float32)),
        grid=(nb, L),
        in_specs=[
            pl.BlockSpec((batch_block, S, D), lambda b, l: (b, 0, 0)),   # activations
            _layer_spec(kernel_params["wq"].shape),
            _layer_spec(kernel_params["wk"].shape),
            _layer_spec(kernel_params["wv"].shape),
            _layer_spec(kernel_params["bq"].shape),
            _layer_spec(kernel_params["bk"].shape),
            _layer_spec(kernel_params["bv"].shape),
            _layer_spec(kernel_params["wo"].shape),
            _layer_spec(kernel_params["bo"].shape),
            _layer_spec(kernel_params["ln1w"].shape),
            _layer_spec(kernel_params["ln1b"].shape),
            _layer_spec(kernel_params["w1"].shape),
            _layer_spec(kernel_params["b1"].shape),
            _layer_spec(kernel_params["w2"].shape),
            _layer_spec(kernel_params["b2"].shape),
            _layer_spec(kernel_params["ln2w"].shape),
            _layer_spec(kernel_params["ln2b"].shape),
        ],
        out_specs=(pl.BlockSpec((batch_block, S, D), lambda b, l: (b, 0, 0)),
                   pl.BlockSpec((batch_block, S, S), lambda b, l: (b, 0, 0))),
        scratch_shapes=[pltpu.VMEM((batch_block, S, D), jnp.float32)],  # layer carry
        compiler_params=pltpu.CompilerParams(
            dimension_semantics=("parallel", "arbitrary"),
            vmem_limit_bytes=48 * 1024 * 1024),
    )(x, kernel_params["wq"], kernel_params["wk"], kernel_params["wv"],
      kernel_params["bq"], kernel_params["bk"], kernel_params["bv"],
      kernel_params["wo"], kernel_params["bo"],
      kernel_params["ln1w"], kernel_params["ln1b"],
      kernel_params["w1"], kernel_params["b1"],
      kernel_params["w2"], kernel_params["b2"],
      kernel_params["ln2w"], kernel_params["ln2b"])

    # norm=None in this configuration (optional final norm omitted)
    return jnp.transpose(out, (1, 0, 2)), attn


# ---------------------------------------------------------------------------
# Pure-JAX reference (float32 everywhere) for correctness validation
# ---------------------------------------------------------------------------
def reference_encoder(src, layer_params, nhead, eps=1e-5):
    S, B, D = src.shape
    hd = D // nhead
    x = jnp.transpose(src, (1, 0, 2))                 # (B, S, D)
    attn_avg = None
    for p in layer_params:
        wqkv, bqkv = p["in_proj_weight"], p["in_proj_bias"]
        q = x @ wqkv[:D].T + bqkv[:D]
        k = x @ wqkv[D:2 * D].T + bqkv[D:2 * D]
        v = x @ wqkv[2 * D:].T + bqkv[2 * D:]

        def heads(t):
            return t.reshape(B, S, nhead, hd).transpose(0, 2, 1, 3)   # (B, H, S, hd)

        qh, kh, vh = heads(q), heads(k), heads(v)
        s = jnp.einsum('bhqe,bhke->bhqk', qh, kh) / math.sqrt(hd)
        pr = jax.nn.softmax(s, axis=-1)
        attn_avg = jnp.mean(pr, axis=1)                               # (B, S, S)
        ctx = jnp.einsum('bhqk,bhke->bhqe', pr, vh)
        ctx = ctx.transpose(0, 2, 1, 3).reshape(B, S, D)
        attn_out = ctx @ p["out_proj_weight"].T + p["out_proj_bias"]

        x1 = x + attn_out
        mu = x1.mean(-1, keepdims=True)
        var = ((x1 - mu) ** 2).mean(-1, keepdims=True)
        x1n = (x1 - mu) / jnp.sqrt(var + eps) * p["ln1_weight"] + p["ln1_bias"]

        h = jnp.maximum(x1n @ p["linear1_weight"].T + p["linear1_bias"], 0.0)
        ff = h @ p["linear2_weight"].T + p["linear2_bias"]

        x2 = x1n + ff
        mu2 = x2.mean(-1, keepdims=True)
        var2 = ((x2 - mu2) ** 2).mean(-1, keepdims=True)
        x = (x2 - mu2) / jnp.sqrt(var2 + eps) * p["ln2_weight"] + p["ln2_bias"]
    return jnp.transpose(x, (1, 0, 2)), attn_avg


if __name__ == "__main__":
    S, B, D = 8, 2, 32          # seq_len, batch, d_model
    NHEAD = 4
    DFF = 64
    NUM_LAYERS = 2

    root = jax.random.PRNGKey(0)
    src_key, *layer_keys = jax.random.split(root, NUM_LAYERS + 1)

    src = jax.random.normal(src_key, (S, B, D), jnp.float32)
    layer_params = [init_layer_params(k, D, DFF) for k in layer_keys]
    kparams = prepare_kernel_params(layer_params, NHEAD)

    out, attn = transformer_encoder(src, kparams, NHEAD)
    out = jax.block_until_ready(out)
    attn = jax.block_until_ready(attn)

    assert out.shape == (S, B, D), out.shape
    assert attn.shape == (B, S, S), attn.shape
    # attention rows must sum to 1 (softmax normalization is exact f32)
    assert bool(jnp.allclose(jnp.sum(attn, axis=-1), 1.0, atol=1e-4))
    assert bool(jnp.all(jnp.isfinite(out)))

    # Validate against the pure-JAX float32 reference (kernel uses bf16 matmul
    # operands with f32 accumulation -> loose tolerance).
    ref_out, ref_attn = reference_encoder(src, layer_params, NHEAD)
    assert bool(jnp.allclose(out, ref_out, atol=5e-2, rtol=5e-2)), (
        float(jnp.max(jnp.abs(out - ref_out))))
    assert bool(jnp.allclose(attn, ref_attn, atol=1e-2, rtol=1e-2)), (
        float(jnp.max(jnp.abs(attn - ref_attn))))

    print("KERNEL_OK")
</pallas_src>

<mosaic_0001>
module attributes {stable_mosaic.version = 11 : i64} {
  func.func @encoder_stack_kernel(%arg0: i32, %arg1: i32, %arg2: memref<1x8x32xf32, #tpu.memory_space<vmem>>, %arg3: memref<1x4x32x8xbf16, #tpu.memory_space<vmem>>, %arg4: memref<1x4x32x8xbf16, #tpu.memory_space<vmem>>, %arg5: memref<1x4x32x8xbf16, #tpu.memory_space<vmem>>, %arg6: memref<1x4x1x8xf32, #tpu.memory_space<vmem>>, %arg7: memref<1x4x1x8xf32, #tpu.memory_space<vmem>>, %arg8: memref<1x4x1x8xf32, #tpu.memory_space<vmem>>, %arg9: memref<1x4x8x32xbf16, #tpu.memory_space<vmem>>, %arg10: memref<1x1x32xf32, #tpu.memory_space<vmem>>, %arg11: memref<1x1x32xf32, #tpu.memory_space<vmem>>, %arg12: memref<1x1x32xf32, #tpu.memory_space<vmem>>, %arg13: memref<1x32x64xbf16, #tpu.memory_space<vmem>>, %arg14: memref<1x1x64xf32, #tpu.memory_space<vmem>>, %arg15: memref<1x64x32xbf16, #tpu.memory_space<vmem>>, %arg16: memref<1x1x32xf32, #tpu.memory_space<vmem>>, %arg17: memref<1x1x32xf32, #tpu.memory_space<vmem>>, %arg18: memref<1x1x32xf32, #tpu.memory_space<vmem>>, %arg19: memref<1x8x32xf32, #tpu.memory_space<vmem>>, %arg20: memref<1x8x8xf32, #tpu.memory_space<vmem>>, %arg21: memref<1x8x32xf32, #tpu.memory_space<vmem>>) attributes {dimension_semantics = [#tpu.dimension_semantics<parallel>, #tpu.dimension_semantics<arbitrary>], iteration_bounds = array<i64: 2, 2>, scalar_prefetch = 0 : i64, scratch_operands = 1 : i64, tpu.core_type = #tpu.core_type<tc>, window_params = [{transform_indices = @transform_0, window_bounds = array<i64: 1, 8, 32>}, {transform_indices = @transform_1, window_bounds = array<i64: 1, 4, 32, 8>}, {transform_indices = @transform_2, window_bounds = array<i64: 1, 4, 32, 8>}, {transform_indices = @transform_3, window_bounds = array<i64: 1, 4, 32, 8>}, {transform_indices = @transform_4, window_bounds = array<i64: 1, 4, 1, 8>}, {transform_indices = @transform_5, window_bounds = array<i64: 1, 4, 1, 8>}, {transform_indices = @transform_6, window_bounds = array<i64: 1, 4, 1, 8>}, {transform_indices = @transform_7, window_bounds = array<i64: 1, 4, 8, 32>}, {transform_indices = @transform_8, window_bounds = array<i64: 1, 1, 32>}, {transform_indices = @transform_9, window_bounds = array<i64: 1, 1, 32>}, {transform_indices = @transform_10, window_bounds = array<i64: 1, 1, 32>}, {transform_indices = @transform_11, window_bounds = array<i64: 1, 32, 64>}, {transform_indices = @transform_12, window_bounds = array<i64: 1, 1, 64>}, {transform_indices = @transform_13, window_bounds = array<i64: 1, 64, 32>}, {transform_indices = @transform_14, window_bounds = array<i64: 1, 1, 32>}, {transform_indices = @transform_15, window_bounds = array<i64: 1, 1, 32>}, {transform_indices = @transform_16, window_bounds = array<i64: 1, 1, 32>}, {transform_indices = @transform_17, window_bounds = array<i64: 1, 8, 32>}, {transform_indices = @transform_18, window_bounds = array<i64: 1, 8, 8>}]} {
    %c0_i32 = arith.constant 0 : i32
    %0 = arith.cmpi eq, %arg1, %c0_i32 : i32
    %1 = arith.extui %0 : i1 to i32
    %c0_i32_0 = arith.constant 0 : i32
    %2 = arith.cmpi ne, %1, %c0_i32_0 : i32
    scf.if %2 {
      %c0_85 = arith.constant 0 : index
      %c0_86 = arith.constant 0 : index
      %c0_87 = arith.constant 0 : index
      %137 = vector.load %arg2[%c0_85, %c0_86, %c0_87] : memref<1x8x32xf32, #tpu.memory_space<vmem>>, vector<1x8x32xf32>
      %c0_88 = arith.constant 0 : index
      %c0_89 = arith.constant 0 : index
      %c0_90 = arith.constant 0 : index
      %138 = vector.load %arg21[%c0_88, %c0_89, %c0_90] : memref<1x8x32xf32, #tpu.memory_space<vmem>>, vector<1x8x32xf32>
      tpu.vector_store %arg21[%c0_88, %c0_89, %c0_90], %137 {strides = array<i32>} : memref<1x8x32xf32, #tpu.memory_space<vmem>>, vector<1x8x32xf32>,
    } else {
    }
    %c0 = arith.constant 0 : index
    %c0_1 = arith.constant 0 : index
    %c0_2 = arith.constant 0 : index
    %3 = vector.load %arg21[%c0, %c0_1, %c0_2] : memref<1x8x32xf32, #tpu.memory_space<vmem>>, vector<1x8x32xf32>
    %c0_3 = arith.constant 0 : index
    %c0_4 = arith.constant 0 : index
    %c0_5 = arith.constant 0 : index
    %c0_6 = arith.constant 0 : index
    %4 = vector.load %arg3[%c0_3, %c0_4, %c0_5, %c0_6] : memref<1x4x32x8xbf16, #tpu.memory_space<vmem>>, vector<1x4x32x8xbf16>
    %5 = vector.shape_cast %4 : vector<1x4x32x8xbf16> to vector<4x32x8xbf16>
    %c0_7 = arith.constant 0 : index
    %c0_8 = arith.constant 0 : index
    %c0_9 = arith.constant 0 : index
    %c0_10 = arith.constant 0 : index
    %6 = vector.load %arg4[%c0_7, %c0_8, %c0_9, %c0_10] : memref<1x4x32x8xbf16, #tpu.memory_space<vmem>>, vector<1x4x32x8xbf16>
    %7 = vector.shape_cast %6 : vector<1x4x32x8xbf16> to vector<4x32x8xbf16>
    %c0_11 = arith.constant 0 : index
    %c0_12 = arith.constant 0 : index
    %c0_13 = arith.constant 0 : index
    %c0_14 = arith.constant 0 : index
    %8 = vector.load %arg5[%c0_11, %c0_12, %c0_13, %c0_14] : memref<1x4x32x8xbf16, #tpu.memory_space<vmem>>, vector<1x4x32x8xbf16>
    %9 = vector.shape_cast %8 : vector<1x4x32x8xbf16> to vector<4x32x8xbf16>
    %c0_15 = arith.constant 0 : index
    %c0_16 = arith.constant 0 : index
    %c0_17 = arith.constant 0 : index
    %c0_18 = arith.constant 0 : index
    %10 = vector.load %arg6[%c0_15, %c0_16, %c0_17, %c0_18] : memref<1x4x1x8xf32, #tpu.memory_space<vmem>>, vector<1x4x1x8xf32>
    %11 = vector.shape_cast %10 : vector<1x4x1x8xf32> to vector<4x1x8xf32>
    %c0_19 = arith.constant 0 : index
    %c0_20 = arith.constant 0 : index
    %c0_21 = arith.constant 0 : index
    %c0_22 = arith.constant 0 : index
    %12 = vector.load %arg7[%c0_19, %c0_20, %c0_21, %c0_22] : memref<1x4x1x8xf32, #tpu.memory_space<vmem>>, vector<1x4x1x8xf32>
    %13 = vector.shape_cast %12 : vector<1x4x1x8xf32> to vector<4x1x8xf32>
    %c0_23 = arith.constant 0 : index
    %c0_24 = arith.constant 0 : index
    %c0_25 = arith.constant 0 : index
    %c0_26 = arith.constant 0 : index
    %14 = vector.load %arg8[%c0_23, %c0_24, %c0_25, %c0_26] : memref<1x4x1x8xf32, #tpu.memory_space<vmem>>, vector<1x4x1x8xf32>
    %15 = vector.shape_cast %14 : vector<1x4x1x8xf32> to vector<4x1x8xf32>
    %c0_27 = arith.constant 0 : index
    %c0_28 = arith.constant 0 : index
    %c0_29 = arith.constant 0 : index
    %c0_30 = arith.constant 0 : index
    %16 = vector.load %arg9[%c0_27, %c0_28, %c0_29, %c0_30] : memref<1x4x8x32xbf16, #tpu.memory_space<vmem>>, vector<1x4x8x32xbf16>
    %17 = vector.shape_cast %16 : vector<1x4x8x32xbf16> to vector<4x8x32xbf16>
    %c0_31 = arith.constant 0 : index
    %c0_32 = arith.constant 0 : index
    %c0_33 = arith.constant 0 : index
    %18 = vector.load %arg10[%c0_31, %c0_32, %c0_33] : memref<1x1x32xf32, #tpu.memory_space<vmem>>, vector<1x1x32xf32>
    %19 = vector.shape_cast %18 : vector<1x1x32xf32> to vector<1x32xf32>
    %20 = vector.shape_cast %3 : vector<1x8x32xf32> to vector<8x32xf32>
    %21 = arith.truncf %20 : vector<8x32xf32> to vector<8x32xbf16>
    %22 = vector.shape_cast %21 : vector<8x32xbf16> to vector<1x8x32xbf16>
    %23 = vector.shape_cast %22 : vector<1x8x32xbf16> to vector<1x8x32xbf16>
    %24 = vector.broadcast %23 : vector<1x8x32xbf16> to vector<4x8x32xbf16>
    "tpu.trace_start"() <{level = 10 : i32, message = "hsd,hde->hse"}> : () -> ()
    %cst = arith.constant dense<0.000000e+00> : vector<4x8x8xf32>
    %25 = tpu.matmul %24, %5, %cst {dimension_numbers = #tpu.dot_dimension_numbers<[2], [1], [1], [2], [0, 0, 0, 1, 1, 2], [0], [0]>} : vector<4x8x32xbf16>, vector<4x32x8xbf16>, vector<4x8x8xf32> -> vector<4x8x8xf32>
    "tpu.trace_stop"() : () -> ()
    %26 = vector.broadcast %11 : vector<4x1x8xf32> to vector<4x8x8xf32>
    %27 = arith.addf %25, %26 : vector<4x8x8xf32>
    %28 = arith.truncf %27 : vector<4x8x8xf32> to vector<4x8x8xbf16>
    "tpu.trace_start"() <{level = 10 : i32, message = "hsd,hde->hse"}> : () -> ()
    %cst_34 = arith.constant dense<0.000000e+00> : vector<4x8x8xf32>
    %29 = tpu.matmul %24, %7, %cst_34 {dimension_numbers = #tpu.dot_dimension_numbers<[2], [1], [1], [2], [0, 0, 0, 1, 1, 2], [0], [0]>} : vector<4x8x32xbf16>, vector<4x32x8xbf16>, vector<4x8x8xf32> -> vector<4x8x8xf32>
    "tpu.trace_stop"() : () -> ()
    %30 = vector.broadcast %13 : vector<4x1x8xf32> to vector<4x8x8xf32>
    %31 = arith.addf %29, %30 : vector<4x8x8xf32>
    %32 = arith.truncf %31 : vector<4x8x8xf32> to vector<4x8x8xbf16>
    "tpu.trace_start"() <{level = 10 : i32, message = "hsd,hde->hse"}> : () -> ()
    %cst_35 = arith.constant dense<0.000000e+00> : vector<4x8x8xf32>
    %33 = tpu.matmul %24, %9, %cst_35 {dimension_numbers = #tpu.dot_dimension_numbers<[2], [1], [1], [2], [0, 0, 0, 1, 1, 2], [0], [0]>} : vector<4x8x32xbf16>, vector<4x32x8xbf16>, vector<4x8x8xf32> -> vector<4x8x8xf32>
    "tpu.trace_stop"() : () -> ()
    %34 = vector.broadcast %15 : vector<4x1x8xf32> to vector<4x8x8xf32>
    %35 = arith.addf %33, %34 : vector<4x8x8xf32>
    %36 = arith.truncf %35 : vector<4x8x8xf32> to vector<4x8x8xbf16>
    "tpu.trace_start"() <{level = 10 : i32, message = "hqe,hke->hqk"}> : () -> ()
    %cst_36 = arith.constant dense<0.000000e+00> : vector<4x8x8xf32>
    %37 = tpu.matmul %28, %32, %cst_36 {dimension_numbers = #tpu.dot_dimension_numbers<[2], [2], [1], [1], [0, 0, 0, 1, 1, 1], [0], [0]>} : vector<4x8x8xbf16>, vector<4x8x8xbf16>, vector<4x8x8xf32> -> vector<4x8x8xf32>
    "tpu.trace_stop"() : () -> ()
    %cst_37 = arith.constant dense<0xFF800000> : vector<4x8xf32>
    %38 = vector.multi_reduction <maximumf>, %37, %cst_37 [2] : vector<4x8x8xf32> to vector<4x8xf32>
    %39 = vector.shape_cast %38 : vector<4x8xf32> to vector<4x8x1xf32>
    %40 = vector.broadcast %39 : vector<4x8x1xf32> to vector<4x8x8xf32>
    %41 = arith.subf %37, %40 : vector<4x8x8xf32>
    %42 = math.exp %41 : vector<4x8x8xf32>
    %cst_38 = arith.constant dense<0.000000e+00> : vector<4x8xf32>
    %43 = vector.multi_reduction <add>, %42, %cst_38 [2] : vector<4x8x8xf32> to vector<4x8xf32>
    %44 = vector.shape_cast %43 : vector<4x8xf32> to vector<4x8x1xf32>
    %45 = tpu.reciprocal %44 : vector<4x8x1xf32> -> vector<4x8x1xf32>
    %46 = vector.broadcast %45 : vector<4x8x1xf32> to vector<4x8x8xf32>
    %47 = arith.mulf %42, %46 : vector<4x8x8xf32>
    %cst_39 = arith.constant dense<0.000000e+00> : vector<8x8xf32>
    %48 = vector.multi_reduction <add>, %47, %cst_39 [0] : vector<4x8x8xf32> to vector<8x8xf32>
    %cst_40 = arith.constant 4.000000e+00 : f32
    %49 = vector.broadcast %cst_40 : f32 to vector<8x8xf32>
    %50 = arith.divf %48, %49 : vector<8x8xf32>
    %51 = arith.truncf %47 : vector<4x8x8xf32> to vector<4x8x8xbf16>
    "tpu.trace_start"() <{level = 10 : i32, message = "hqk,hke->hqe"}> : () -> ()
    %cst_41 = arith.constant dense<0.000000e+00> : vector<4x8x8xf32>
    %52 = tpu.matmul %51, %36, %cst_41 {dimension_numbers = #tpu.dot_dimension_numbers<[2], [1], [1], [2], [0, 0, 0, 1, 1, 2], [0], [0]>} : vector<4x8x8xbf16>, vector<4x8x8xbf16>, vector<4x8x8xf32> -> vector<4x8x8xf32>
    "tpu.trace_stop"() : () -> ()
    %53 = arith.truncf %52 : vector<4x8x8xf32> to vector<4x8x8xbf16>
    "tpu.trace_start"() <{level = 10 : i32, message = "hse,hed->hsd"}> : () -> ()
    %cst_42 = arith.constant dense<0.000000e+00> : vector<4x8x32xf32>
    %54 = tpu.matmul %53, %17, %cst_42 {dimension_numbers = #tpu.dot_dimension_numbers<[2], [1], [1], [2], [0, 0, 0, 1, 1, 2], [0], [0]>} : vector<4x8x8xbf16>, vector<4x8x32xbf16>, vector<4x8x32xf32> -> vector<4x8x32xf32>
    "tpu.trace_stop"() : () -> ()
    %cst_43 = arith.constant dense<0.000000e+00> : vector<8x32xf32>
    %55 = vector.multi_reduction <add>, %54, %cst_43 [0] : vector<4x8x32xf32> to vector<8x32xf32>
    %56 = vector.broadcast %19 : vector<1x32xf32> to vector<8x32xf32>
    %57 = arith.addf %55, %56 : vector<8x32xf32>
    %58 = vector.shape_cast %57 : vector<8x32xf32> to vector<1x8x32xf32>
    %59 = arith.addf %3, %58 : vector<1x8x32xf32>
    %60 = vector.shape_cast %59 : vector<1x8x32xf32> to vector<8x32xf32>
    %cst_44 = arith.constant dense<0.000000e+00> : vector<8xf32>
    %61 = vector.multi_reduction <add>, %60, %cst_44 [1] : vector<8x32xf32> to vector<8xf32>
    %62 = vector.shape_cast %61 : vector<8xf32> to vector<8x1xf32>
    %cst_45 = arith.constant 3.200000e+01 : f32
    %63 = vector.broadcast %cst_45 : f32 to vector<8x1xf32>
    %64 = arith.divf %62, %63 : vector<8x1xf32>
    %65 = vector.broadcast %64 : vector<8x1xf32> to vector<8x32xf32>
    %66 = arith.subf %60, %65 : vector<8x32xf32>
    %67 = arith.mulf %66, %66 : vector<8x32xf32>
    %cst_46 = arith.constant dense<0.000000e+00> : vector<8xf32>
    %68 = vector.multi_reduction <add>, %67, %cst_46 [1] : vector<8x32xf32> to vector<8xf32>
    %69 = vector.shape_cast %68 : vector<8xf32> to vector<8x1xf32>
    %cst_47 = arith.constant 3.200000e+01 : f32
    %70 = vector.broadcast %cst_47 : f32 to vector<8x1xf32>
    %71 = arith.divf %69, %70 : vector<8x1xf32>
    %72 = vector.broadcast %64 : vector<8x1xf32> to vector<8x32xf32>
    %73 = arith.subf %60, %72 : vector<8x32xf32>
    %cst_48 = arith.constant 9.99999974E-6 : f32
    %74 = vector.broadcast %cst_48 : f32 to vector<8x1xf32>
    %75 = arith.addf %71, %74 : vector<8x1xf32>
    %76 = math.rsqrt %75 : vector<8x1xf32>
    %77 = vector.broadcast %76 : vector<8x1xf32> to vector<8x32xf32>
    %78 = arith.mulf %73, %77 : vector<8x32xf32>
    %c0_49 = arith.constant 0 : index
    %c0_50 = arith.constant 0 : index
    %c0_51 = arith.constant 0 : index
    %79 = vector.load %arg11[%c0_49, %c0_50, %c0_51] : memref<1x1x32xf32, #tpu.memory_space<vmem>>, vector<1x1x32xf32>
    %80 = vector.shape_cast %79 : vector<1x1x32xf32> to vector<1x32xf32>
    %81 = vector.broadcast %80 : vector<1x32xf32> to vector<8x32xf32>
    %82 = arith.mulf %78, %81 : vector<8x32xf32>
    %c0_52 = arith.constant 0 : index
    %c0_53 = arith.constant 0 : index
    %c0_54 = arith.constant 0 : index
    %83 = vector.load %arg12[%c0_52, %c0_53, %c0_54] : memref<1x1x32xf32, #tpu.memory_space<vmem>>, vector<1x1x32xf32>
    %84 = vector.shape_cast %83 : vector<1x1x32xf32> to vector<1x32xf32>
    %85 = vector.broadcast %84 : vector<1x32xf32> to vector<8x32xf32>
    %86 = arith.addf %82, %85 : vector<8x32xf32>
    %87 = arith.truncf %86 : vector<8x32xf32> to vector<8x32xbf16>
    %c0_55 = arith.constant 0 : index
    %c0_56 = arith.constant 0 : index
    %c0_57 = arith.constant 0 : index
    %88 = vector.load %arg13[%c0_55, %c0_56, %c0_57] : memref<1x32x64xbf16, #tpu.memory_space<vmem>>, vector<1x32x64xbf16>
    %89 = vector.shape_cast %88 : vector<1x32x64xbf16> to vector<32x64xbf16>
    %cst_58 = arith.constant dense<0.000000e+00> : vector<8x64xf32>
    %90 = tpu.matmul %87, %89, %cst_58 {dimension_numbers = #tpu.dot_dimension_numbers<[1], [0], [0], [1], [0, 0, 1, 1], [], []>} : vector<8x32xbf16>, vector<32x64xbf16>, vector<8x64xf32> -> vector<8x64xf32>
    %c0_59 = arith.constant 0 : index
    %c0_60 = arith.constant 0 : index
    %c0_61 = arith.constant 0 : index
    %91 = vector.load %arg14[%c0_59, %c0_60, %c0_61] : memref<1x1x64xf32, #tpu.memory_space<vmem>>, vector<1x1x64xf32>
    %92 = vector.shape_cast %91 : vector<1x1x64xf32> to vector<1x64xf32>
    %93 = vector.broadcast %92 : vector<1x64xf32> to vector<8x64xf32>
    %94 = arith.addf %90, %93 : vector<8x64xf32>
    %cst_62 = arith.constant 0.000000e+00 : f32
    %95 = vector.broadcast %cst_62 : f32 to vector<8x64xf32>
    %96 = arith.maximumf %94, %95 : vector<8x64xf32>
    %97 = arith.truncf %96 : vector<8x64xf32> to vector<8x64xbf16>
    %c0_63 = arith.constant 0 : index
    %c0_64 = arith.constant 0 : index
    %c0_65 = arith.constant 0 : index
    %98 = vector.load %arg15[%c0_63, %c0_64, %c0_65] : memref<1x64x32xbf16, #tpu.memory_space<vmem>>, vector<1x64x32xbf16>
    %99 = vector.shape_cast %98 : vector<1x64x32xbf16> to vector<64x32xbf16>
    %cst_66 = arith.constant dense<0.000000e+00> : vector<8x32xf32>
    %100 = tpu.matmul %97, %99, %cst_66 {dimension_numbers = #tpu.dot_dimension_numbers<[1], [0], [0], [1], [0, 0, 1, 1], [], []>} : vector<8x64xbf16>, vector<64x32xbf16>, vector<8x32xf32> -> vector<8x32xf32>
    %c0_67 = arith.constant 0 : index
    %c0_68 = arith.constant 0 : index
    %c0_69 = arith.constant 0 : index
    %101 = vector.load %arg16[%c0_67, %c0_68, %c0_69] : memref<1x1x32xf32, #tpu.memory_space<vmem>>, vector<1x1x32xf32>
    %102 = vector.shape_cast %101 : vector<1x1x32xf32> to vector<1x32xf32>
    %103 = vector.broadcast %102 : vector<1x32xf32> to vector<8x32xf32>
    %104 = arith.addf %100, %103 : vector<8x32xf32>
    %105 = arith.addf %86, %104 : vector<8x32xf32>
    %cst_70 = arith.constant dense<0.000000e+00> : vector<8xf32>
    %106 = vector.multi_reduction <add>, %105, %cst_70 [1] : vector<8x32xf32> to vector<8xf32>
    %107 = vector.shape_cast %106 : vector<8xf32> to vector<8x1xf32>
    %cst_71 = arith.constant 3.200000e+01 : f32
    %108 = vector.broadcast %cst_71 : f32 to vector<8x1xf32>
    %109 = arith.divf %107, %108 : vector<8x1xf32>
    %110 = vector.broadcast %109 : vector<8x1xf32> to vector<8x32xf32>
    %111 = arith.subf %105, %110 : vector<8x32xf32>
    %112 = arith.mulf %111, %111 : vector<8x32xf32>
    %cst_72 = arith.constant dense<0.000000e+00> : vector<8xf32>
    %113 = vector.multi_reduction <add>, %112, %cst_72 [1] : vector<8x32xf32> to vector<8xf32>
    %114 = vector.shape_cast %113 : vector<8xf32> to vector<8x1xf32>
    %cst_73 = arith.constant 3.200000e+01 : f32
    %115 = vector.broadcast %cst_73 : f32 to vector<8x1xf32>
    %116 = arith.divf %114, %115 : vector<8x1xf32>
    %117 = vector.broadcast %109 : vector<8x1xf32> to vector<8x32xf32>
    %118 = arith.subf %105, %117 : vector<8x32xf32>
    %cst_74 = arith.constant 9.99999974E-6 : f32
    %119 = vector.broadcast %cst_74 : f32 to vector<8x1xf32>
    %120 = arith.addf %116, %119 : vector<8x1xf32>
    %121 = math.rsqrt %120 : vector<8x1xf32>
    %122 = vector.broadcast %121 : vector<8x1xf32> to vector<8x32xf32>
    %123 = arith.mulf %118, %122 : vector<8x32xf32>
    %c0_75 = arith.constant 0 : index
    %c0_76 = arith.constant 0 : index
    %c0_77 = arith.constant 0 : index
    %124 = vector.load %arg17[%c0_75, %c0_76, %c0_77] : memref<1x1x32xf32, #tpu.memory_space<vmem>>, vector<1x1x32xf32>
    %125 = vector.shape_cast %124 : vector<1x1x32xf32> to vector<1x32xf32>
    %126 = vector.broadcast %125 : vector<1x32xf32> to vector<8x32xf32>
    %127 = arith.mulf %123, %126 : vector<8x32xf32>
    %c0_78 = arith.constant 0 : index
    %c0_79 = arith.constant 0 : index
    %c0_80 = arith.constant 0 : index
    %128 = vector.load %arg18[%c0_78, %c0_79, %c0_80] : memref<1x1x32xf32, #tpu.memory_space<vmem>>, vector<1x1x32xf32>
    %129 = vector.shape_cast %128 : vector<1x1x32xf32> to vector<1x32xf32>
    %130 = vector.broadcast %129 : vector<1x32xf32> to vector<8x32xf32>
    %131 = arith.addf %127, %130 : vector<8x32xf32>
    %132 = vector.shape_cast %131 : vector<8x32xf32> to vector<1x8x32xf32>
    %c0_81 = arith.constant 0 : index
    %c0_82 = arith.constant 0 : index
    %c0_83 = arith.constant 0 : index
    %133 = vector.load %arg21[%c0_81, %c0_82, %c0_83] : memref<1x8x32xf32, #tpu.memory_space<vmem>>, vector<1x8x32xf32>
    tpu.vector_store %arg21[%c0_81, %c0_82, %c0_83], %132 {strides = array<i32>} : memref<1x8x32xf32, #tpu.memory_space<vmem>>, vector<1x8x32xf32>,
    %c1_i32 = arith.constant 1 : i32
    %134 = arith.cmpi eq, %arg1, %c1_i32 : i32
    %135 = arith.extui %134 : i1 to i32
    %c0_i32_84 = arith.constant 0 : i32
    %136 = arith.cmpi ne, %135, %c0_i32_84 : i32
    scf.if %136 {
      %c0_85 = arith.constant 0 : index
      %c0_86 = arith.constant 0 : index
      %c0_87 = arith.constant 0 : index
      %137 = vector.load %arg19[%c0_85, %c0_86, %c0_87] : memref<1x8x32xf32, #tpu.memory_space<vmem>>, vector<1x8x32xf32>
      tpu.vector_store %arg19[%c0_85, %c0_86, %c0_87], %132 {strides = array<i32>} : memref<1x8x32xf32, #tpu.memory_space<vmem>>, vector<1x8x32xf32>,
      %138 = vector.shape_cast %50 : vector<8x8xf32> to vector<1x8x8xf32>
      %c0_88 = arith.constant 0 : index
      %c0_89 = arith.constant 0 : index
      %c0_90 = arith.constant 0 : index
      %139 = vector.load %arg20[%c0_88, %c0_89, %c0_90] : memref<1x8x8xf32, #tpu.memory_space<vmem>>, vector<1x8x8xf32>
      tpu.vector_store %arg20[%c0_88, %c0_89, %c0_90], %138 {strides = array<i32>} : memref<1x8x8xf32, #tpu.memory_space<vmem>>, vector<1x8x8xf32>,
    } else {
    }
    return
  }
  func.func @transform_0(%arg0: i32, %arg1: i32) -> (i32, i32, i32) {
    %c0_i32 = arith.constant 0 : i32
    %c0_i32_0 = arith.constant 0 : i32
    %c0_i32_1 = arith.constant 0 : i32
    return %arg0, %c0_i32, %c0_i32_0 : i32, i32, i32
  }
  func.func @transform_1(%arg0: i32, %arg1: i32) -> (i32, i32, i32, i32) {
    %c0_i32 = arith.constant 0 : i32
    %c0_i32_0 = arith.constant 0 : i32
    %c0_i32_1 = arith.constant 0 : i32
    %c0_i32_2 = arith.constant 0 : i32
    return %arg1, %c0_i32, %c0_i32_0, %c0_i32_1 : i32, i32, i32, i32
  }
  func.func @transform_2(%arg0: i32, %arg1: i32) -> (i32, i32, i32, i32) {
    %c0_i32 = arith.constant 0 : i32
    %c0_i32_0 = arith.constant 0 : i32
    %c0_i32_1 = arith.constant 0 : i32
    %c0_i32_2 = arith.constant 0 : i32
    return %arg1, %c0_i32, %c0_i32_0, %c0_i32_1 : i32, i32, i32, i32
  }
  func.func @transform_3(%arg0: i32, %arg1: i32) -> (i32, i32, i32, i32) {
    %c0_i32 = arith.constant 0 : i32
    %c0_i32_0 = arith.constant 0 : i32
    %c0_i32_1 = arith.constant 0 : i32
    %c0_i32_2 = arith.constant 0 : i32
    return %arg1, %c0_i32, %c0_i32_0, %c0_i32_1 : i32, i32, i32, i32
  }
  func.func @transform_4(%arg0: i32, %arg1: i32) -> (i32, i32, i32, i32) {
    %c0_i32 = arith.constant 0 : i32
    %c0_i32_0 = arith.constant 0 : i32
    %c0_i32_1 = arith.constant 0 : i32
    %c0_i32_2 = arith.constant 0 : i32
    return %arg1, %c0_i32, %c0_i32_0, %c0_i32_1 : i32, i32, i32, i32
  }
  func.func @transform_5(%arg0: i32, %arg1: i32) -> (i32, i32, i32, i32) {
    %c0_i32 = arith.constant 0 : i32
    %c0_i32_0 = arith.constant 0 : i32
    %c0_i32_1 = arith.constant 0 : i32
    %c0_i32_2 = arith.constant 0 : i32
    return %arg1, %c0_i32, %c0_i32_0, %c0_i32_1 : i32, i32, i32, i32
  }
  func.func @transform_6(%arg0: i32, %arg1: i32) -> (i32, i32, i32, i32) {
    %c0_i32 = arith.constant 0 : i32
    %c0_i32_0 = arith.constant 0 : i32
    %c0_i32_1 = arith.constant 0 : i32
    %c0_i32_2 = arith.constant 0 : i32
    return %arg1, %c0_i32, %c0_i32_0, %c0_i32_1 : i32, i32, i32, i32
  }
  func.func @transform_7(%arg0: i32, %arg1: i32) -> (i32, i32, i32, i32) {
    %c0_i32 = arith.constant 0 : i32
    %c0_i32_0 = arith.constant 0 : i32
    %c0_i32_1 = arith.constant 0 : i32
    %c0_i32_2 = arith.constant 0 : i32
    return %arg1, %c0_i32, %c0_i32_0, %c0_i32_1 : i32, i32, i32, i32
  }
  func.func @transform_8(%arg0: i32, %arg1: i32) -> (i32, i32, i32) {
    %c0_i32 = arith.constant 0 : i32
    %c0_i32_0 = arith.constant 0 : i32
    %c0_i32_1 = arith.constant 0 : i32
    return %arg1, %c0_i32, %c0_i32_0 : i32, i32, i32
  }
  func.func @transform_9(%arg0: i32, %arg1: i32) -> (i32, i32, i32) {
    %c0_i32 = arith.constant 0 : i32
    %c0_i32_0 = arith.constant 0 : i32
    %c0_i32_1 = arith.constant 0 : i32
    return %arg1, %c0_i32, %c0_i32_0 : i32, i32, i32
  }
  func.func @transform_10(%arg0: i32, %arg1: i32) -> (i32, i32, i32) {
    %c0_i32 = arith.constant 0 : i32
    %c0_i32_0 = arith.constant 0 : i32
    %c0_i32_1 = arith.constant 0 : i32
    return %arg1, %c0_i32, %c0_i32_0 : i32, i32, i32
  }
  func.func @transform_11(%arg0: i32, %arg1: i32) -> (i32, i32, i32) {
    %c0_i32 = arith.constant 0 : i32
    %c0_i32_0 = arith.constant 0 : i32
    %c0_i32_1 = arith.constant 0 : i32
    return %arg1, %c0_i32, %c0_i32_0 : i32, i32, i32
  }
  func.func @transform_12(%arg0: i32, %arg1: i32) -> (i32, i32, i32) {
    %c0_i32 = arith.constant 0 : i32
    %c0_i32_0 = arith.constant 0 : i32
    %c0_i32_1 = arith.constant 0 : i32
    return %arg1, %c0_i32, %c0_i32_0 : i32, i32, i32
  }
  func.func @transform_13(%arg0: i32, %arg1: i32) -> (i32, i32, i32) {
    %c0_i32 = arith.constant 0 : i32
    %c0_i32_0 = arith.constant 0 : i32
    %c0_i32_1 = arith.constant 0 : i32
    return %arg1, %c0_i32, %c0_i32_0 : i32, i32, i32
  }
  func.func @transform_14(%arg0: i32, %arg1: i32) -> (i32, i32, i32) {
    %c0_i32 = arith.constant 0 : i32
    %c0_i32_0 = arith.constant 0 : i32
    %c0_i32_1 = arith.constant 0 : i32
    return %arg1, %c0_i32, %c0_i32_0 : i32, i32, i32
  }
  func.func @transform_15(%arg0: i32, %arg1: i32) -> (i32, i32, i32) {
    %c0_i32 = arith.constant 0 : i32
    %c0_i32_0 = arith.constant 0 : i32
    %c0_i32_1 = arith.constant 0 : i32
    return %arg1, %c0_i32, %c0_i32_0 : i32, i32, i32
  }
  func.func @transform_16(%arg0: i32, %arg1: i32) -> (i32, i32, i32) {
    %c0_i32 = arith.constant 0 : i32
    %c0_i32_0 = arith.constant 0 : i32
    %c0_i32_1 = arith.constant 0 : i32
    return %arg1, %c0_i32, %c0_i32_0 : i32, i32, i32
  }
  func.func @transform_17(%arg0: i32, %arg1: i32) -> (i32, i32, i32) {
    %c0_i32 = arith.constant 0 : i32
    %c0_i32_0 = arith.constant 0 : i32
    %c0_i32_1 = arith.constant 0 : i32
    return %arg0, %c0_i32, %c0_i32_0 : i32, i32, i32
  }
  func.func @transform_18(%arg0: i32, %arg1: i32) -> (i32, i32, i32) {
    %c0_i32 = arith.constant 0 : i32
    %c0_i32_0 = arith.constant 0 : i32
    %c0_i32_1 = arith.constant 0 : i32
    return %arg0, %c0_i32, %c0_i32_0 : i32, i32, i32
  }
}

</mosaic_0001>

<bundles_post_ra>
// kernel: tpu_custom_call.1
= control target key start
LH: loop header
LB: loop body
LE: loop exit
PB: predicated region body
PF: predicated region fallthrough
CT: control target
= control target key end

     0   :  { %s3077_s0 = inlined_call_operand.vmem [shape: f32[2,8,32], index: 0, kind: input, shape index: {}]   ;;  %s3078_s1 = inlined_call_operand.vmem [shape: bf16[2,4,32,8], index: 1, kind: input, shape index: {}]   ;;  %s3079_s2 = inlined_call_operand.vmem [shape: bf16[2,4,32,8], index: 2, kind: input, shape index: {}]   ;;  %s3080_s3 = inlined_call_operand.vmem [shape: bf16[2,4,32,8], index: 3, kind: input, shape index: {}]   ;;  %s3081_s4 = inlined_call_operand.vmem [shape: f32[2,4,1,8], index: 4, kind: input, shape index: {}]   ;;  %s3082_s5 = inlined_call_operand.vmem [shape: f32[2,4,1,8], index: 5, kind: input, shape index: {}]   ;;  %s3083_s6 = inlined_call_operand.vmem [shape: f32[2,4,1,8], index: 6, kind: input, shape index: {}]   ;;  %s3084_s7 = inlined_call_operand.vmem [shape: bf16[2,4,8,32], index: 7, kind: input, shape index: {}]   ;;  %s3085_s8 = inlined_call_operand.vmem [shape: f32[2,1,32], index: 8, kind: input, shape index: {}]   ;;  %s3086_s9 = inlined_call_operand.vmem [shape: f32[2,1,32], index: 9, kind: input, shape index: {}]   ;;  %s3087_s10 = inlined_call_operand.vmem [shape: f32[2,1,32], index: 10, kind: input, shape index: {}]   ;;  %s3088_s11 = inlined_call_operand.vmem [shape: bf16[2,32,64], index: 11, kind: input, shape index: {}]   ;;  %s3089_s12 = inlined_call_operand.vmem [shape: f32[2,1,64], index: 12, kind: input, shape index: {}]   ;;  %s3090_s13 = inlined_call_operand.vmem [shape: bf16[2,64,32], index: 13, kind: input, shape index: {}]   ;;  %s3091_s14 = inlined_call_operand.vmem [shape: f32[2,1,32], index: 14, kind: input, shape index: {}]   ;;  %s3092_s15 = inlined_call_operand.vmem [shape: f32[2,1,32], index: 15, kind: input, shape index: {}]   ;;  %s3093_s16 = inlined_call_operand.vmem [shape: f32[2,1,32], index: 16, kind: input, shape index: {}]   ;;  %s3094_s17 = inlined_call_operand.hbm [shape: f32[2,8,32], index: 17, kind: output, shape index: {0}]   ;;  %s3095_s18 = inlined_call_operand.hbm [shape: f32[2,8,8], index: 18, kind: output, shape index: {1}]  }
   0x1   :  { %3117 = sst [smem:[#allocation27_spill]] %s3077_s0 }
   0x2   :  { %3118 = sst [smem:[#allocation28_spill]] %s3078_s1 }
   0x3   :  { %3119 = sst [smem:[#allocation29_spill]] %s3079_s2 }
   0x4   :  { %3120 = sst [smem:[#allocation30_spill]] %s3080_s3 }
   0x5   :  { %3121 = sst [smem:[#allocation31_spill]] %s3081_s4 }
   0x6   :  { %3122 = sst [smem:[#allocation32_spill]] %s3082_s5 }
   0x7   :  { %3123 = sst [smem:[#allocation33_spill]] %s3083_s6 }
   0x8   :  { %3124 = sst [smem:[#allocation34_spill]] %s3084_s7 }
   0x9   :  { %3125 = sst [smem:[#allocation35_spill]] %s3088_s11 }
   0xa   :  { %3126 = sst [smem:[#allocation36_spill]] %s3093_s16 }
   0xb   :  { %3127 = sst [smem:[#allocation37_spill]] %s3094_s17 }
   0xc   :  { %3128 = sst [smem:[#allocation38_spill]] %s3095_s18 }
   0xd   :  { %24 = vsyncpa [#allocation4], 0 }
   0xe   :  { %26 = vsyncpa [#allocation4 + $0x1], 0 }
   0xf   :  { %27 = vsyncpa [#allocation6], 0 }
  0x10   :  { %29 = vsyncpa [#allocation6 + $0x1], 0  ;;  %s2690_s27 = smov 0   ;;  %s2692_s28 = smov 0  }
  0x11   :  { %s2694_s29 = smov 0   ;;  %s2696_s30 = smov 0  }
  0x12   :  { %s2698_s0 = smov 0   ;;  %s2700_s19 = smov 0  }
  0x13   :  { %s2702_s1 = smov 0   ;;  %s2704_s20 = smov 0  }
  0x14 LB: > { %3129 = sst [smem:[#allocation9_spill]] %s2563_s27  ;;  %s2131_s21 = sadd.s32 4294967295, %s2591_s20   ;;  %s2591_s20 = sphi %s2704_s20, %s35_s20   ;;  %s2587_s1 = sphi %s2702_s1, %s3185_s1   ;;  %s2583_s19 = sphi %s2700_s19, %s3184_s19   ;;  %s2579_s0 = sphi %s2698_s0, %s3183_s0   ;;  %s2575_s30 = sphi %s2696_s30, %s3182_s30   ;;  %s2571_s29 = sphi %s2694_s29, %s3181_s29   ;;  %s2567_s28 = sphi %s2692_s28, %s3180_s28   ;;  %s2563_s27 = sphi %s2690_s27, %s3179_s27  }
  0x15   : > { %3130 = sst [smem:[#allocation10_spill]] %s2567_s28  ;;  %s2132_s22 = sadd.s32 4294967294, %s2591_s20  }
  0x16   : > { %3131 = sst [smem:[#allocation11_spill]] %s2571_s29  ;;  %s44_s2 = sadd.s32 1, %s2583_s19 }
  0x17   : > { %3132 = sst [smem:[#allocation12_spill]] %s2575_s30  ;;  %p45_p0 = scmp.ge.s32.totalorder %s44_s2, 2 }
  0x18   : > { %3133 = sst [smem:[#allocation13_spill]] %s2579_s0  ;;  %s47_s23 = sadd.s32 1, %s2587_s1 }
  0x19   : > { %3134 = sst [smem:[#allocation14_spill]] %s2583_s19  ;;  %p506_p1 = scmp.ne.s32.totalorder %s2571_s29, %s2567_s28 }
  0x1a   : > { %3135 = sst [smem:[#allocation15_spill]] %s2587_s1  ;;  %p507_p2 = scmp.eq.s32.totalorder %s2131_s21, 3 }
  0x1b   : > { %3136 = sst [smem:[#allocation16_spill]] %s2591_s20  ;;  %s3187_s2 = smov (%p45_p0, %s44_s2), 0 }
  0x1c   : > { %3137 = sst [smem:[#allocation17_spill]] %s3187_s2  ;;  %s3189_s23 = smov (!%p45_p0, %s47_s23), %s2587_s1 }
  0x1d   : > { %p2739_p3 = por %p507_p2, %p506_p1  ;;  %p512_p4 = scmp.ne.s32.totalorder %s2567_s28, %s2563_s27 }
  0x1e   : > { %p49_p5 = scmp.ge.s32.totalorder %s3189_s23, 2  ;;  %p513_p6 = scmp.eq.s32.totalorder %s2132_s22, 3 }
  0x1f   : > { %s3138_s24 = scalar_select %p2739_p3, 1, 0 }
  0x20   : > { %p2135_p7 = scmp.ge.s32.totalorder %s2591_s20, 1  ;;  %p675_p8 = scmp.lt.s32.totalorder %s2591_s20, 5 }
  0x21   : > { %3139 = sst [smem:[#allocation18_spill]] %s3138_s24  ;;  %s3191_s23 = smov (%p49_p5, %s3189_s23), 0 }
  0x22   : > { %3140 = sst [smem:[#allocation19_spill]] %s3191_s23  ;;  %p2749_p9 = por %p513_p6, %p512_p4 }
  0x23   : > { %p676_p10 = pnand %p2135_p7, %p675_p8  ;;  %s493_s26 = ssub.s32 %s2587_s1, %s3191_s23 }
  0x24   : > { %s3141_s25 = scalar_select %p2749_p9, 1, 0 }
  0x25   : > { %s496_s21 = sadd.s32 1, %s2571_s29  ;;  %p494_p11 = scmp.eq.s32.totalorder %s493_s26, 0 }
  0x26   : > { %3142 = sst [smem:[#allocation20_spill]] %s3141_s25  ;;  %679 = sbr.rel (%p676_p10) target bundleno = 1777 (0x6f1), region = 88 }
  0x27   : > { %s2757_s2 = scalar_select %p494_p11, %s2571_s29, %s496_s21  }
  0x29   : > { %3143 = sst [smem:[#allocation21_spill]] %s2757_s2 }
  0x2b   : > { %s2760_s22 = sand.u32 1, %s2567_s28   ;;  %p796_p12 = scmp.lt.s32.totalorder %s2579_s0, 1 }
  0x2c   : > { %3144 = sst [smem:[#allocation22_spill]] %s2760_s22  ;;  %s2136_s19 = sshll.u32 %s2760_s22, 3 }
  0x2d   : > { %p800_p13 = scmp.lt.s32.totalorder %s2575_s30, 1  ;;  %s3145_s1 = sld [smem:[#allocation27_spill]] }
  0x2e   : > { %s797_s27 = scalar_select %p796_p12, %s2579_s0, 1 }
  0x2f   : > { %s2767_s25 = scalar_select %p800_p13, %s2575_s30, 1 }
  0x30   : > { %s2138_s26 = sshll.u32 %s797_s27, 3  ;;  %s3146_s18 = sld [smem:[#allocation28_spill]] }
  0x31   : > { %s2308_s29 = sshll.u32 %s2767_s25, 6  ;;  %s3148_s0 = sld [smem:[#allocation29_spill]] }
  0x32   : > { %s3149_s3 = sld [smem:[#allocation30_spill]]  ;;  %s2311_s16 = sshll.u32 %s2767_s25, 4 }
  0x33   : > { %s799_s2 = scalar_lea.vmem %s3145_s1, %s2138_s26  ;;  %s2145_s1 = sshll.u32 %s2767_s25, 2 }
  0x34   : > { %s3151_s4 = sld [smem:[#allocation31_spill]]  ;;  %s856_s21 = scalar_lea.vmem %s3091_s14, %s2767_s25 }
  0x35   : > { %s3153_s5 = sld [smem:[#allocation32_spill]]  ;;  %s2851_s27 = scalar_lea.vmem [#allocation5], %s2136_s19 }
  0x36   : > { %s2776_s17 = scalar_lea.vmem %s3146_s18, %s2308_s29  ;;  %s3154_s6 = sld [smem:[#allocation33_spill]] }
  0x37   : > { %3147 = sst [smem:[#allocation23_spill]] %s2776_s17  ;;  %s2781_s30 = scalar_lea.vmem %s3148_s0, %s2308_s29 }
  0x38   : > { %s2786_s23 = scalar_lea.vmem %s3149_s3, %s2308_s29  ;;  %s3155_s7 = sld [smem:[#allocation34_spill]] }
  0x39   : > { %3150 = sst [smem:[#allocation24_spill]] %s2786_s23  ;;  %s2849_s29 = scalar_lea.vmem [#allocation3], %s2136_s19 }
  0x3a   : > { %s2792_s28 = scalar_lea.vmem %s3151_s4, %s2145_s1  ;;  %s3157_s11 = sld [smem:[#allocation35_spill]] }
  0x3b   : > { %3152 = sst [smem:[#allocation25_spill]] %s2792_s28  ;;  %s2797_s17 = scalar_lea.vmem %s3153_s5, %s2145_s1 }
  0x3c   : > { %s2802_s22 = scalar_lea.vmem %s3154_s6, %s2145_s1  ;;  %s859_s1 = scalar_lea.vmem %s3092_s15, %s2767_s25 }
  0x3d   : > { %s3158_s0 = sld [smem:[#allocation36_spill]] }
  0x3e   : > { %s2808_s3 = scalar_lea.vmem %s3155_s7, %s2311_s16  ;;  %s3159_s7 = sld [smem:[#allocation12_spill]] }
  0x3f   : > { %3156 = sst [smem:[#allocation26_spill]] %s2808_s3  ;;  %s2313_s3 = sshll.u32 %s2767_s25, 5 }
  0x40   : > { %s2825_s6 = scalar_lea.vmem %s3157_s11, %s2311_s16  ;;  %s2839_s18 = scalar_lea.vmem %s3090_s13, %s2313_s3 }
  0x43   : > { %s862_s11 = scalar_lea.vmem %s3158_s0, %s2767_s25 }
  0x44   : > { %p2154_p0 = scmp.ne.s32.totalorder %s3159_s7, 0 }
  0x46   : > { %867 = sbr.rel (%p2154_p0) target bundleno = 77 (0x4d), region = 92 }
  0x4b   : > { %v868_v0 = vld [vmem:[%s799_s2] sm:$0xff]  ;;  %vm869_vm0 = vcmask 261120  }
  0x4c   : > { %870 = vst.msk [vmem:[#allocation2] sm:$0xff] %vm869_vm0, %v868_v0 }
  0x4d PF: > { %s3160_s3 = sld [smem:[#allocation23_spill]]  ;;  %v2323_v10 = vld [vmem:[%s2781_s30 + $0x8] sm:$0xff]  ;;  %v2325_v11 = vld [vmem:[%s2781_s30 + $0x18] sm:$0xff]  ;;  %vm962_vm1 = vcmask 261120   ;;  %v2322_v15 = vld [vmem:[%s2781_s30] sm:$0xff]  ;;  %vm1290_vm2 = vcmask 64512   ;;  %s3165_s23 = scalar_lea.vmem %s3086_s9, %s2767_s25 }
  0x4e   : > { %v2327_v13 = vld [vmem:[%s2781_s30 + $0x28] sm:$0xff]  ;;  %v2329_v14 = vld [vmem:[%s2781_s30 + $0x38] sm:$0xff]  ;;  %v2324_v16 = vld [vmem:[%s2781_s30 + $0x10] sm:$0xff]  ;;  %s3161_s7 = sld [smem:[#allocation24_spill]]  ;;  %vm1485_vm3 = vcmask 1043456   ;;  %s3166_s28 = scalar_lea.vmem %s3087_s10, %s2767_s25 }
  0x4f   : > { %v2326_v17 = vld [vmem:[%s2781_s30 + $0x20] sm:$0xff]  ;;  %v2328_v18 = vld [vmem:[%s2781_s30 + $0x30] sm:$0xff]  ;;  %s3162_s30 = sld [smem:[#allocation25_spill]]  ;;  %s3167_s16 = scalar_lea.vmem %s3089_s12, %s2767_s25 }
  0x50   : > { %v2426_v33 = vld [vmem:[%s2797_s17] ss:$0 sm:$0xff]  ;;  %v2427_v34 = vld [vmem:[%s2797_s17 + $0x1] ss:$0 sm:$0xff]  ;;  %v2428_v45 = vld [vmem:[%s2797_s17 + $0x2] ss:$0 sm:$0xff] }
  0x51   : > { %v2429_v46 = vld [vmem:[%s2797_s17 + $0x3] ss:$0 sm:$0xff]  ;;  %s3163_s17 = sld [smem:[#allocation26_spill]] }
  0x52   : > { %s3169_s19 = sld [smem:[#allocation12_spill]] }
  0x53   : > { %v2315_v1 = vld [vmem:[%s3160_s3 + $0x8] sm:$0xff]  ;;  %v2317_v2 = vld [vmem:[%s3160_s3 + $0x18] sm:$0xff]  ;;  %v2314_v5 = vld [vmem:[%s3160_s3] sm:$0xff] }
  0x54   : > { %v2319_v3 = vld [vmem:[%s3160_s3 + $0x28] sm:$0xff]  ;;  %v2321_v4 = vld [vmem:[%s3160_s3 + $0x38] sm:$0xff]  ;;  %972 = vmatpush.bf16.msra.mxu0 %v2315_v1  ;;  %997 = vmatpush.bf16.msra.mxu1 %v2317_v2  ;;  %v2316_v6 = vld [vmem:[%s3160_s3 + $0x10] sm:$0xff] }
  0x55   : > { %v2860_v7 = vld [vmem:[#allocation2] sm:$0xff]  ;;  %1022 = vmatpush.bf16.msra.mxu2 %v2319_v3  ;;  %1047 = vmatpush.bf16.msra.mxu3 %v2321_v4  ;;  %v2320_v9 = vld [vmem:[%s3160_s3 + $0x30] sm:$0xff]  ;;  %v2335_v19 = vld [vmem:[%s3161_s7 + $0x28] sm:$0xff] }
  0x56   : > { %v2318_v8 = vld [vmem:[%s3160_s3 + $0x20] sm:$0xff]  ;;  %v937_v12 = vpack.c.bf16 %v2860_v7, %v2860_v7  ;;  %v2331_v20 = vld [vmem:[%s3161_s7 + $0x8] sm:$0xff]  ;;  %v2333_v21 = vld [vmem:[%s3161_s7 + $0x18] sm:$0xff] }
  0x57   : > { %v2334_v22 = vld [vmem:[%s3161_s7 + $0x20] sm:$0xff]  ;;  %v2332_v24 = vld [vmem:[%s3161_s7 + $0x10] sm:$0xff]  ;;  %v2337_v25 = vld [vmem:[%s3161_s7 + $0x38] sm:$0xff] }
  0x58   : > { %973 = vmatpush.bf16.msra.mxu0 %v2314_v5  ;;  %998 = vmatpush.bf16.msra.mxu1 %v2316_v6  ;;  %v2330_v23 = vld [vmem:[%s3161_s7] sm:$0xff]  ;;  %v2336_v26 = vld [vmem:[%s3161_s7 + $0x30] sm:$0xff]  ;;  %p2301_p1 = scmp.ne.s32.totalorder %s3169_s19, 1 }
  0x59   : > { %1023 = vmatpush.bf16.msra.mxu2 %v2318_v8  ;;  %1048 = vmatpush.bf16.msra.mxu3 %v2320_v9  ;;  %v2423_v41 = vld [vmem:[%s3162_s30 + $0x1] ss:$0 sm:$0xff]  ;;  %v2422_v44 = vld [vmem:[%s3162_s30] ss:$0 sm:$0xff]  ;;  %v2424_v58 = vld [vmem:[%s3162_s30 + $0x2] ss:$0 sm:$0xff] }
  0x5a   : > { %v2425_v59 = vld [vmem:[%s3162_s30 + $0x3] ss:$0 sm:$0xff]  ;;  %v2430_v8 = vld [vmem:[%s2802_s22] ss:$0 sm:$0xff]  ;;  %v2431_v9 = vld [vmem:[%s2802_s22 + $0x1] ss:$0 sm:$0xff] }
  0x5b   : > { %2163 = vmatmul.msk.bf16.vlgmr.msra.gmra.mxu0 %vm962_vm1, %v937_v12  ;;  %2172 = vmatmul.msk.bf16.vlgmr.msra.gmra.mxu1 %vm962_vm1, %v937_v12 }
  0x5c   : > { %1088 = vmatpush.bf16.msrb.mxu0 %v2323_v10  ;;  %1113 = vmatpush.bf16.msrb.mxu1 %v2325_v11 }
  0x5d   : > { %2181 = vmatmul.msk.bf16.vlgmr.msra.gmra.mxu2 %vm962_vm1, %v937_v12  ;;  %2190 = vmatmul.msk.bf16.vlgmr.msra.gmra.mxu3 %vm962_vm1, %v937_v12 }
  0x5e   : > { %1138 = vmatpush.bf16.msrb.mxu2 %v2327_v13  ;;  %1163 = vmatpush.bf16.msrb.mxu3 %v2329_v14  ;;  %v2432_v14 = vld [vmem:[%s2802_s22 + $0x2] ss:$0 sm:$0xff] }
  0x60   : > { %1089 = vmatpush.bf16.msrb.mxu0 %v2322_v15  ;;  %1114 = vmatpush.bf16.msrb.mxu1 %v2324_v16 }
  0x62   : > { %1139 = vmatpush.bf16.msrb.mxu2 %v2326_v17  ;;  %1164 = vmatpush.bf16.msrb.mxu3 %v2328_v18 }
  0x64   : > { %1204 = vmatpush.bf16.msra.mxu0 %v2331_v20  ;;  %1229 = vmatpush.bf16.msra.mxu1 %v2333_v21 }
  0x66   : > { %1254 = vmatpush.bf16.msra.mxu2 %v2335_v19  ;;  %1279 = vmatpush.bf16.msra.mxu3 %v2337_v25  ;;  %v2433_v25 = vld [vmem:[%s2802_s22 + $0x3] ss:$0 sm:$0xff]  ;;  %s3164_s22 = scalar_lea.vmem %s3085_s8, %s2767_s25 }
  0x68   : > { %1205 = vmatpush.bf16.msra.mxu0 %v2330_v23  ;;  %1230 = vmatpush.bf16.msra.mxu1 %v2332_v24 }
  0x6a   : > { %1255 = vmatpush.bf16.msra.mxu2 %v2334_v22  ;;  %1280 = vmatpush.bf16.msra.mxu3 %v2336_v26 }
  0x6b   : > { %2199 = vmatmul.msk.bf16.vlgmr.msrb.gmra.mxu0 %vm962_vm1, %v937_v12  ;;  %2208 = vmatmul.msk.bf16.vlgmr.msrb.gmra.mxu1 %vm962_vm1, %v937_v12 }
  0x6d   : > { %2217 = vmatmul.msk.bf16.vlgmr.msrb.gmra.mxu2 %vm962_vm1, %v937_v12  ;;  %2226 = vmatmul.msk.bf16.vlgmr.msrb.gmra.mxu3 %vm962_vm1, %v937_v12 }
  0x7b   : > { %2235 = vmatmul.msk.bf16.vlgmr.msra.gmra.mxu0 %vm962_vm1, %v937_v12  ;;  %2244 = vmatmul.msk.bf16.vlgmr.msra.gmra.mxu1 %vm962_vm1, %v937_v12 }
  0x7d   : > { %2253 = vmatmul.msk.bf16.vlgmr.msra.gmra.mxu2 %vm962_vm1, %v937_v12  ;;  %2262 = vmatmul.msk.bf16.vlgmr.msra.gmra.mxu3 %vm962_vm1, %v937_v12 }
  0xd8   : > { %v975_v27 = vpop.f32.mrf.mxu0  ;;  %v1000_v28 = vpop.f32.mrf.mxu1 }
  0xd9   : > { %v1001_v49 = vadd.f32 %v2423_v41, %v1000_v28  ;;  %v976_v52 = vadd.f32 %v2422_v44, %v975_v27 }
  0xdb   : > { %v1055_v57 = vpack.c.bf16 %v1001_v49, %v1001_v49  ;;  %v1054_v62 = vpack.c.bf16 %v976_v52, %v976_v52 }
  0xe0   : > { %v1025_v29 = vpop.f32.mrf.mxu2  ;;  %v1050_v30 = vpop.f32.mrf.mxu3 }
  0xe1   : > { %v977_v31 = vpop.f32.mrf.mxu0  ;;  %v1002_v32 = vpop.f32.mrf.mxu1  ;;  %v1026_v1 = vadd.f32 %v2424_v58, %v1025_v29  ;;  %v1051_v2 = vadd.f32 %v2425_v59, %v1050_v30 }
  0xe3   : > { %v1056_v5 = vpack.c.bf16 %v1026_v1, %v1026_v1  ;;  %v1057_v6 = vpack.c.bf16 %v1051_v2, %v1051_v2 }
  0xe8   : > { %v1027_v35 = vpop.f32.mrf.mxu2  ;;  %v1052_v36 = vpop.f32.mrf.mxu3 }
  0xe9   : > { %v1091_v37 = vpop.f32.mrf.mxu0  ;;  %v1116_v38 = vpop.f32.mrf.mxu1 }
  0xea   : > { %v1092_v39 = vadd.f32 %v2426_v33, %v1091_v37  ;;  %v1117_v40 = vadd.f32 %v2427_v34, %v1116_v38 }
  0xec   : > { %v1170_v42 = vpack.c.bf16 %v1092_v39, %v1092_v39  ;;  %v1171_v43 = vpack.c.bf16 %v1117_v40, %v1117_v40 }
  0xee   : > { %v1295_v47 = vsel %vm1290_vm2, %v1170_v42, 0  ;;  %v1314_v48 = vsel %vm1290_vm2, %v1171_v43, 0 }
  0xef   : > { %1304 = vmatpush.bf16.xpose.msrb.mxu0 %v1295_v47  ;;  %1323 = vmatpush.bf16.xpose.msrb.mxu1 %v1314_v48 }
  0xf0   : > { %v1141_v50 = vpop.f32.mrf.mxu2  ;;  %v1166_v51 = vpop.f32.mrf.mxu3 }
  0xf1   : > { %v1142_v53 = vadd.f32 %v2428_v45, %v1141_v50  ;;  %v1167_v54 = vadd.f32 %v2429_v46, %v1166_v51  ;;  %v1093_v55 = vpop.f32.mrf.mxu0  ;;  %v1118_v56 = vpop.f32.mrf.mxu1 }
  0xf3   : > { %v1172_v60 = vpack.c.bf16 %v1142_v53, %v1142_v53  ;;  %v1173_v61 = vpack.c.bf16 %v1167_v54, %v1167_v54 }
  0xf5   : > { %v1333_v63 = vsel %vm1290_vm2, %v1172_v60, 0  ;;  %v1352_v0 = vsel %vm1290_vm2, %v1173_v61, 0 }
  0xf6   : > { %1342 = vmatpush.bf16.xpose.msrb.mxu2 %v1333_v63  ;;  %1361 = vmatpush.bf16.xpose.msrb.mxu3 %v1352_v0 }
  0xf7   : > { %2263 = vmatmul.msk.bf16.vlgmr.msrb.gmra.mxu0 %vm1290_vm2, %v1054_v62  ;;  %2264 = vmatmul.msk.bf16.vlgmr.msrb.gmra.mxu1 %vm1290_vm2, %v1055_v57 }
  0xf8   : > { %v1143_v3 = vpop.f32.mrf.mxu2  ;;  %v1168_v4 = vpop.f32.mrf.mxu3 }
  0xf9   : > { %v1207_v10 = vpop.f32.mrf.mxu0  ;;  %v1232_v11 = vpop.f32.mrf.mxu1 }
  0xfa   : > { %v1208_v12 = vadd.f32 %v2430_v8, %v1207_v10  ;;  %v1233_v13 = vadd.f32 %v2431_v9, %v1232_v11  ;;  %v2593_v11 = vmov 4.0  }
  0xfc   : > { %v1286_v15 = vpack.c.bf16 %v1208_v12, %v1208_v12  ;;  %v1287_v16 = vpack.c.bf16 %v1233_v13, %v1233_v13 }
  0xfd   : > { %2265 = vmatmul.msk.bf16.vlgmr.msrb.gmra.mxu2 %vm1290_vm2, %v1056_v5  ;;  %2266 = vmatmul.msk.bf16.vlgmr.msrb.gmra.mxu3 %vm1290_vm2, %v1057_v6 }
  0xfe   : > { %v1487_v18 = vsel %vm1485_vm3, %v1286_v15, 0  ;;  %v1506_v19 = vsel %vm1485_vm3, %v1287_v16, 0 }
  0xff   : > { %1496 = vmatpush.bf16.msra.mxu0 %v1487_v18  ;;  %1515 = vmatpush.bf16.msra.mxu1 %v1506_v19 }
 0x100   : > { %v1257_v17 = vpop.f32.mrf.mxu2  ;;  %v1282_v26 = vpop.f32.mrf.mxu3 }
 0x101   : > { %v1258_v20 = vadd.f32 %v2432_v14, %v1257_v17  ;;  %v1209_v22 = vpop.f32.mrf.mxu0  ;;  %v1234_v23 = vpop.f32.mrf.mxu1  ;;  %v1283_v28 = vadd.f32 %v2433_v25, %v1282_v26 }
 0x103   : > { %v1288_v21 = vpack.c.bf16 %v1258_v20, %v1258_v20  ;;  %v1289_v29 = vpack.c.bf16 %v1283_v28, %v1283_v28 }
 0x105   : > { %v1525_v24 = vsel %vm1485_vm3, %v1288_v21, 0  ;;  %v1544_v30 = vsel %vm1485_vm3, %v1289_v29, 0 }
 0x106   : > { %1534 = vmatpush.bf16.msra.mxu2 %v1525_v24  ;;  %1553 = vmatpush.bf16.msra.mxu3 %v1544_v30 }
 0x108   : > { %v1259_v27 = vpop.f32.mrf.mxu2  ;;  %v1284_v31 = vpop.f32.mrf.mxu3 }
 0x174   : > { %v1306_v32 = vpop.f32.mrf.mxu0  ;;  %v1325_v33 = vpop.f32.mrf.mxu1 }
 0x175   : > { %v1367_v34 = vsel %vm1290_vm2, %v1306_v32, -inf  ;;  %v1370_v37 = vsel %vm1290_vm2, %v1325_v33, -inf }
 0x176   : > { %1368 = vmax.xlane.f32.xlu1 %v1367_v34 }
 0x17c   : > { %v1308_v35 = vpop.f32.mrf.mxu0  ;;  %v1327_v36 = vpop.f32.mrf.mxu1 }
 0x17e   : > { %1371 = vmax.xlane.f32.xlu1 %v1370_v37 }
 0x180   : > { %v1344_v38 = vpop.f32.mrf.mxu2  ;;  %v1363_v39 = vpop.f32.mrf.mxu3 }
 0x181   : > { %v1373_v40 = vsel %vm1290_vm2, %v1344_v38, -inf  ;;  %v1376_v43 = vsel %vm1290_vm2, %v1363_v39, -inf }
 0x182   : > { %1374 = vmax.xlane.f32.xlu0 %v1373_v40 }
 0x188   : > { %v1346_v41 = vpop.f32.mrf.mxu2  ;;  %v1365_v42 = vpop.f32.mrf.mxu3 }
 0x18a   : > { %1377 = vmax.xlane.f32.xlu0 %v1376_v43 }
 0x1e9   : > { %v1369_v44 = vpop.xlane.xlu1 %1368 }
 0x1ea   : > { %v1379_v45 = vsub.f32 %v1306_v32, %v1369_v44 }
 0x1ec   : > { %v1383_v46 = vmul.f32 1.442695, %v1379_v45 }
 0x1ee   : > { %2441 = vpow2.f32 %v1383_v46 }
 0x1f1   : > { %v1372_v47 = vpop.xlane.xlu1 %1371 }
 0x1f2   : > { %v1380_v48 = vsub.f32 %v1325_v33, %v1372_v47 }
 0x1f4   : > { %v2442_v49 = vpop.eup %2441  ;;  %v1385_v50 = vmul.f32 1.442695, %v1380_v48 }
 0x1f5   : > { %v1375_v51 = vpop.xlane.xlu0 %1374  ;;  %v1391_v52 = vsel %vm1290_vm2, %v2442_v49, 0.0 }
 0x1f6   : > { %2443 = vpow2.f32 %v1385_v50  ;;  %v1381_v53 = vsub.f32 %v1344_v38, %v1375_v51  ;;  %1392 = vadd.xlane.f32.xlu0 %v1391_v52 }
 0x1f8   : > { %v1387_v54 = vmul.f32 1.442695, %v1381_v53 }
 0x1fa   : > { %2445 = vpow2.f32 %v1387_v54 }
 0x1fc   : > { %v2923_v55 = vpop.eup %2443 }
 0x1fd   : > { %v1378_v56 = vpop.xlane.xlu0 %1377  ;;  %v1394_v57 = vsel %vm1290_vm2, %v2923_v55, 0.0 }
 0x1fe   : > { %v1382_v58 = vsub.f32 %v1363_v39, %v1378_v56  ;;  %1395 = vadd.xlane.f32.xlu1 %v1394_v57 }
 0x200   : > { %v2927_v59 = vpop.eup %2445  ;;  %v1389_v60 = vmul.f32 1.442695, %v1382_v58 }
 0x201   : > { %v1397_v61 = vsel %vm1290_vm2, %v2927_v59, 0.0 }
 0x202   : > { %2447 = vpow2.f32 %v1389_v60  ;;  %1398 = vadd.xlane.f32.xlu2 %v1397_v61 }
 0x208   : > { %v2931_v62 = vpop.eup %2447 }
 0x209   : > { %v1400_v63 = vsel %vm1290_vm2, %v2931_v62, 0.0 }
 0x20a   : > { %1401 = vadd.xlane.f32.xlu2 %v1400_v63 }
 0x269   : > { %v1393_v0 = vpop.xlane.xlu0 %1392 }
 0x26a   : > { %2449 = vrcp.f32 %v1393_v0  ;;  %v1414_v5 = vand.u32 2147483648, %v1393_v0  ;;  %v1412_v8 = vand.u32 2147483647, %v1393_v0  ;;  %vm1408_vm5 = vweird.f32 %v1393_v0 }
 0x26c   : > { %v1415_v13 = vor.u32 1.1754944e-38, %v1414_v5  ;;  %vm1413_vm7 = vcmp.eq.f32.partialorder %v1412_v8, 8.507059e+37  ;;  %v932_v5 = vld [vmem:[%s3163_s17] sm:$0xf]  ;;  %v933_v8 = vld [vmem:[%s3163_s17 + $0x4] sm:$0xf] }
 0x270   : > { %v2450_v1 = vpop.eup %2449 }
 0x271   : > { %v1404_v2 = vmul.f32 %v2450_v1, %v1393_v0  ;;  %v1396_v3 = vpop.xlane.xlu1 %1395  ;;  %vm1409_vm4 = vweird.f32 %v2450_v1 }
 0x272   : > { %2451 = vrcp.f32 %v1396_v3  ;;  %vm1410_vm6 = vmor %vm1408_vm5, %vm1409_vm4  ;;  %v1428_v20 = vand.u32 2147483648, %v1396_v3  ;;  %v1426_v23 = vand.u32 2147483647, %v1396_v3  ;;  %vm1422_vm9 = vweird.f32 %v1396_v3 }
 0x273   : > { %v1405_v4 = vsub.f32 1.0, %v1404_v2 }
 0x274   : > { %v1429_v29 = vor.u32 1.1754944e-38, %v1428_v20  ;;  %vm1427_vm11 = vcmp.eq.f32.partialorder %v1426_v23, 8.507059e+37 }
 0x275   : > { %v1406_v6 = vmul.f32 %v2450_v1, %v1405_v4  ;;  %v1399_v9 = vpop.xlane.xlu2 %1398 }
 0x276   : > { %2453 = vrcp.f32 %v1399_v9  ;;  %v1440_v30 = vand.u32 2147483647, %v1399_v9  ;;  %v1442_v31 = vand.u32 2147483648, %v1399_v9  ;;  %vm1436_vm13 = vweird.f32 %v1399_v9 }
 0x277   : > { %v1407_v10 = vadd.f32 %v2450_v1, %v1406_v6  ;;  %2455 = vrcp.f32 %v2593_v11  ;;  %v1567_v6 = vsel %vm1485_vm3, %v932_v5, 0  ;;  %v935_v11 = vld [vmem:[%s3163_s17 + $0xc] sm:$0xf] }
 0x278   : > { %v2452_v12 = vpop.eup %2451  ;;  %vm1441_vm15 = vcmp.eq.f32.partialorder %v1440_v30, 8.507059e+37  ;;  %v1443_v39 = vor.u32 1.1754944e-38, %v1442_v31  ;;  %1576 = vmatpush.bf16.msrb.mxu0 %v1567_v6  ;;  %v2435_v6 = vld [vmem:[%s3165_s23] ss:$0 sm:$0xff] }
 0x279   : > { %v1411_v14 = vsel %vm1410_vm6, %v2450_v1, %v1407_v10  ;;  %v1418_v15 = vmul.f32 %v2452_v12, %v1396_v3  ;;  %vm1423_vm8 = vweird.f32 %v2452_v12  ;;  %v934_v10 = vld [vmem:[%s3163_s17 + $0x8] sm:$0xf] }
 0x27a   : > { %v1416_v16 = vsel %vm1413_vm7, %v1415_v13, %v1411_v14  ;;  %vm1424_vm10 = vmor %vm1422_vm9, %vm1423_vm8 }
 0x27b   : > { %v1459_v17 = vmul.f32 %v2442_v49, %v1416_v16  ;;  %v1419_v18 = vsub.f32 1.0, %v1418_v15 }
 0x27c   : > { %v2454_v19 = vpop.eup %2453 }
 0x27d   : > { %v2456_v21 = vpop.eup %2455  ;;  %v1420_v22 = vmul.f32 %v2452_v12, %v1419_v18  ;;  %v1432_v24 = vmul.f32 %v2454_v19, %v1399_v9  ;;  %v1402_v25 = vpop.xlane.xlu2 %1401  ;;  %v1478_v28 = vpack.c.bf16 %v1459_v17, %v1459_v17  ;;  %vm1437_vm12 = vweird.f32 %v2454_v19 }
 0x27e   : > { %2457 = vrcp.f32 %v1402_v25  ;;  %v1471_v32 = vmul.f32 4.0, %v2456_v21  ;;  %vm1438_vm14 = vmor %vm1436_vm13, %vm1437_vm12  ;;  %v1463_v41 = vsel %vm1290_vm2, %v1459_v17, 0.0  ;;  %v1454_v51 = vand.u32 2147483647, %v1402_v25 }
 0x27f   : > { %v1421_v26 = vadd.f32 %v2452_v12, %v1420_v22  ;;  %v1433_v27 = vsub.f32 1.0, %v1432_v24  ;;  %2267 = vmatmul.msk.bf16.vlgmr.msra.gmra.mxu0 %vm1290_vm2, %v1478_v28  ;;  %v1456_v52 = vand.u32 2147483648, %v1402_v25  ;;  %vm1450_vm4 = vweird.f32 %v1402_v25 }
 0x280   : > { %v1472_v40 = vsub.f32 1.0, %v1471_v32  ;;  %vm1455_vm6 = vcmp.eq.f32.partialorder %v1454_v51, 8.507059e+37  ;;  %vm1475_vm7 = vweird.f32 %v2456_v21  ;;  %v1586_v9 = vsel %vm1485_vm3, %v933_v8, 0 }
 0x281   : > { %v1425_v33 = vsel %vm1424_vm10, %v2452_v12, %v1421_v26  ;;  %v1434_v34 = vmul.f32 %v2454_v19, %v1433_v27  ;;  %v1457_v58 = vor.u32 1.1754944e-38, %v1456_v52  ;;  %1595 = vmatpush.bf16.msrb.mxu1 %v1586_v9  ;;  %v1624_v12 = vsel %vm1485_vm3, %v935_v11, 0  ;;  %v2436_v9 = vld [vmem:[%s3166_s28] ss:$0 sm:$0xff] }
 0x282   : > { %v1430_v35 = vsel %vm1427_vm11, %v1429_v29, %v1425_v33  ;;  %v1473_v50 = vmul.f32 %v2456_v21, %v1472_v40  ;;  %1633 = vmatpush.bf16.msrb.mxu3 %v1624_v12  ;;  %vm1765_vm11 = vcmask 523264  }
 0x283   : > { %v1460_v36 = vmul.f32 %v2923_v55, %v1430_v35  ;;  %v1435_v37 = vadd.f32 %v2454_v19, %v1434_v34 }
 0x284   : > { %v2458_v38 = vpop.eup %2457 }
 0x285   : > { %v1464_v42 = vsel %vm1290_vm2, %v1460_v36, 0.0  ;;  %v1439_v43 = vsel %vm1438_vm14, %v2454_v19, %v1435_v37  ;;  %v1446_v44 = vmul.f32 %v2458_v38, %v1402_v25  ;;  %v1479_v47 = vpack.c.bf16 %v1460_v36, %v1460_v36  ;;  %v2434_v37 = vld [vmem:[%s3164_s22] ss:$0 sm:$0xff] }
 0x286   : > { %v1465_v45 = vadd.f32 %v1464_v42, %v1463_v41  ;;  %v1444_v46 = vsel %vm1441_vm15, %v1443_v39, %v1439_v43  ;;  %vm1451_vm0 = vweird.f32 %v2458_v38 }
 0x287   : > { %v1461_v48 = vmul.f32 %v2927_v59, %v1444_v46  ;;  %v1447_v49 = vsub.f32 1.0, %v1446_v44  ;;  %2268 = vmatmul.msk.bf16.vlgmr.msra.gmra.mxu1 %vm1290_vm2, %v1479_v47  ;;  %vm1452_vm5 = vmor %vm1450_vm4, %vm1451_vm0  ;;  %v1474_v59 = vadd.f32 %v2456_v21, %v1473_v50  ;;  %v2594_v44 = vmov 32.0  }
 0x288   : > { %2459 = vrcp.f32 %v2594_v44 }
 0x289   : > { %v1466_v53 = vsel %vm1290_vm2, %v1461_v48, 0.0  ;;  %v1448_v54 = vmul.f32 %v2458_v38, %v1447_v49  ;;  %v1480_v55 = vpack.c.bf16 %v1461_v48, %v1461_v48  ;;  %v1476_v0 = vsel %vm1475_vm7, %v2456_v21, %v1474_v59 }
 0x28a   : > { %v1467_v56 = vadd.f32 %v1466_v53, %v1465_v45 }
 0x28b   : > { %v1449_v57 = vadd.f32 %v2458_v38, %v1448_v54  ;;  %2269 = vmatmul.msk.bf16.vlgmr.msra.gmra.mxu2 %vm1290_vm2, %v1480_v55  ;;  %v2339_v55 = vld [vmem:[%s2825_s6 + $0x8] sm:$0xff] }
 0x28c   : > { %1720 = vmatpush.bf16.msra.mxu0 %v2339_v55 }
 0x28d   : > { %v1453_v60 = vsel %vm1452_vm5, %v2458_v38, %v1449_v57  ;;  %v2343_v57 = vld [vmem:[%s2839_s18 + $0x18] sm:$0xff] }
 0x28e   : > { %v1458_v61 = vsel %vm1455_vm6, %v1457_v58, %v1453_v60  ;;  %v2460_v45 = vpop.eup %2459  ;;  %1773 = vmatpush.bf16.msra.mxu1 %v2343_v57  ;;  %v2342_v60 = vld [vmem:[%s2839_s18 + $0x10] sm:$0xff] }
 0x28f   : > { %v1462_v63 = vmul.f32 %v2931_v62, %v1458_v61  ;;  %v1605_v62 = vsel %vm1485_vm3, %v934_v10, 0  ;;  %v1655_v46 = vmul.f32 32.0, %v2460_v45  ;;  %vm1659_vm3 = vweird.f32 %v2460_v45 }
 0x290   : > { %1614 = vmatpush.bf16.msrb.mxu2 %v1605_v62 }
 0x291   : > { %v1468_v1 = vsel %vm1290_vm2, %v1462_v63, 0.0  ;;  %v1481_v2 = vpack.c.bf16 %v1462_v63, %v1462_v63  ;;  %v1656_v47 = vsub.f32 1.0, %v1655_v46 }
 0x292   : > { %v1469_v3 = vadd.f32 %v1468_v1, %v1467_v56  ;;  %v2338_v56 = vld [vmem:[%s2825_s6] sm:$0xff]  ;;  %1774 = vmatpush.bf16.msra.mxu1 %v2342_v60 }
 0x293   : > { %2270 = vmatmul.msk.bf16.vlgmr.msra.gmra.mxu3 %vm1290_vm2, %v1481_v2  ;;  %v1657_v48 = vmul.f32 %v2460_v45, %v1656_v47  ;;  %1721 = vmatpush.bf16.msra.mxu0 %v2338_v56 }
 0x294   : > { %v2946_v4 = vmul.f32 %v1476_v0, %v1469_v3 }
 0x295   : > { %v1658_v49 = vadd.f32 %v2460_v45, %v1657_v48 }
 0x297   : > { %v1660_v50 = vsel %vm1659_vm3, %v2460_v45, %v1658_v49 }
 0x2fc   : > { %v1498_v13 = vpop.f32.mrf.mxu0 }
 0x2fd   : > { %v1559_v14 = vpack.c.bf16 %v1498_v13, %v1498_v13  ;;  %v2341_v13 = vld [vmem:[%s2839_s18 + $0x8] sm:$0xff] }
 0x2fe   : > { %1775 = vmatpush.bf16.msra.mxu1 %v2341_v13 }
 0x2ff   : > { %2271 = vmatmul.msk.bf16.vlgmr.msrb.gmra.mxu0 %vm1290_vm2, %v1559_v14  ;;  %v2340_v14 = vld [vmem:[%s2839_s18] sm:$0xff] }
 0x302   : > { %1776 = vmatpush.bf16.msra.mxu1 %v2340_v14 }
 0x304   : > { %v1517_v15 = vpop.f32.mrf.mxu1  ;;  %v1500_v16 = vpop.f32.mrf.mxu0 }
 0x305   : > { %v1560_v17 = vpack.c.bf16 %v1517_v15, %v1517_v15  ;;  %v2437_v15 = vld [vmem:[%s3167_s16] ss:$0 sm:$0xff] }
 0x307   : > { %2272 = vmatmul.msk.bf16.vlgmr.msrb.gmra.mxu1 %vm1290_vm2, %v1560_v17 }
 0x30c   : > { %v1519_v18 = vpop.f32.mrf.mxu1 }
 0x30e   : > { %v1536_v19 = vpop.f32.mrf.mxu2 }
 0x30f   : > { %v1561_v20 = vpack.c.bf16 %v1536_v19, %v1536_v19 }
 0x311   : > { %2273 = vmatmul.msk.bf16.vlgmr.msrb.gmra.mxu2 %vm1290_vm2, %v1561_v20 }
 0x316   : > { %v1538_v21 = vpop.f32.mrf.mxu2  ;;  %v1555_v22 = vpop.f32.mrf.mxu3 }
 0x317   : > { %v1562_v23 = vpack.c.bf16 %v1555_v22, %v1555_v22  ;;  %v2438_v21 = vld [vmem:[%s856_s21] ss:$0 sm:$0xff] }
 0x319   : > { %2274 = vmatmul.msk.bf16.vlgmr.msrb.gmra.mxu3 %vm1290_vm2, %v1562_v23 }
 0x31e   : > { %v1557_v24 = vpop.f32.mrf.mxu3 }
 0x37c   : > { %v1578_v25 = vpop.f32.mrf.mxu0 }
 0x37d   : > { %v1639_v31 = vsel %vm962_vm1, %v1578_v25, 0.0 }
 0x384   : > { %v1597_v26 = vpop.f32.mrf.mxu1  ;;  %v1580_v27 = vpop.f32.mrf.mxu0 }
 0x385   : > { %v1640_v30 = vsel %vm962_vm1, %v1597_v26, 0.0 }
 0x386   : > { %v1641_v33 = vadd.f32 %v1640_v30, %v1639_v31 }
 0x38c   : > { %v1599_v28 = vpop.f32.mrf.mxu1 }
 0x394   : > { %v1616_v29 = vpop.f32.mrf.mxu2 }
 0x395   : > { %v1642_v32 = vsel %vm962_vm1, %v1616_v29, 0.0 }
 0x396   : > { %v1643_v34 = vadd.f32 %v1642_v32, %v1641_v33 }
 0x39c   : > { %v1618_v35 = vpop.f32.mrf.mxu2  ;;  %v1635_v36 = vpop.f32.mrf.mxu3 }
 0x39d   : > { %v1644_v38 = vsel %vm962_vm1, %v1635_v36, 0.0 }
 0x39e   : > { %v1645_v39 = vadd.f32 %v1644_v38, %v1643_v34 }
 0x3a0   : > { %v1649_v40 = vadd.f32 %v2434_v37, %v1645_v39 }
 0x3a2   : > { %v1650_v41 = vadd.f32 %v1649_v40, %v2860_v7 }
 0x3a4   : > { %v1637_v42 = vpop.f32.mrf.mxu3  ;;  %v1651_v43 = vsel %vm962_vm1, %v1650_v41, 0.0 }
 0x3a5   : > { %1652 = vadd.xlane.f32.xlu2 %v1651_v43  ;;  %v2440_v43 = vld [vmem:[%s862_s11] ss:$0 sm:$0xff] }
 0x418   : > { %v1653_v51 = vpop.xlane.xlu2 %1652 }
 0x419   : > { %v1661_v52 = vmul.f32 %v1660_v50, %v1653_v51 }
 0x41b   : > { %v1662_v7 = vsub.f32 %v1650_v41, %v1661_v52  ;;  %v2439_v41 = vld [vmem:[%s859_s1] ss:$0 sm:$0xff] }
 0x41d   : > { %v1663_v53 = vmul.f32 %v1662_v7, %v1662_v7 }
 0x41f   : > { %v1664_v54 = vsel %vm962_vm1, %v1663_v53, 0.0 }
 0x420   : > { %1665 = vadd.xlane.f32.xlu0 %v1664_v54 }
 0x493   : > { %v1666_v58 = vpop.xlane.xlu0 %1665 }
 0x494   : > { %v1667_v59 = vmul.f32 %v1666_v58, %v1660_v50 }
 0x496   : > { %v1668_v61 = vadd.f32 1e-05, %v1667_v59 }
 0x498   : > { %2461 = vrsqrt.f32 %v1668_v61  ;;  %vm1675_vm9 = vweird.f32 %v1668_v61 }
 0x49e   : > { %v2462_v63 = vpop.eup %2461 }
 0x49f   : > { %v1670_v0 = vmul.f32 %v2462_v63, %v1668_v61  ;;  %vm1676_vm8 = vweird.f32 %v2462_v63 }
 0x4a0   : > { %vm1677_vm10 = vmor %vm1675_vm9, %vm1676_vm8 }
 0x4a1   : > { %v1671_v1 = vmul.f32 %v2462_v63, %v1670_v0 }
 0x4a3   : > { %v1672_v2 = vmul.f32 0.5, %v1671_v1 }
 0x4a5   : > { %v1673_v3 = vsub.f32 1.5, %v1672_v2 }
 0x4a7   : > { %v1674_v5 = vmul.f32 %v2462_v63, %v1673_v3 }
 0x4a9   : > { %v1678_v8 = vsel %vm1677_vm10, %v2462_v63, %v1674_v5 }
 0x4aa   : > { %v1679_v10 = vmul.f32 %v1678_v8, %v1662_v7 }
 0x4ac   : > { %v1684_v62 = vmul.f32 %v2435_v6, %v1679_v10 }
 0x4ae   : > { %v1689_v11 = vadd.f32 %v2436_v9, %v1684_v62 }
 0x4b0   : > { %v1690_v12 = vpack.c.bf16 %v1689_v11, %v1689_v11 }
 0x4b2   : > { %2283 = vmatmul.msk.bf16.vlgmr.msra.gmra.mxu0 %vm962_vm1, %v1690_v12 }
 0x52f   : > { %v1723_v16 = vpop.f32.mrf.mxu0 }
 0x530   : > { %v1724_v17 = vadd.f32 %v2437_v15, %v1723_v16 }
 0x532   : > { %v1727_v18 = vmax.f32 %v1724_v17, 0.0 }
 0x534   : > { %v1728_v19 = vpack.c.bf16 %v1727_v18, %v1727_v18 }
 0x536   : > { %2300 = vmatmul.msk.bf16.vlgmr.msra.gmra.mxu1 %vm1765_vm11, %v1728_v19 }
 0x537   : > { %v1725_v20 = vpop.f32.mrf.mxu0 }
 0x5b3   : > { %v1778_v22 = vpop.f32.mrf.mxu1 }
 0x5b4   : > { %v1779_v23 = vadd.f32 %v2438_v21, %v1778_v22 }
 0x5b6   : > { %v1782_v24 = vadd.f32 %v1779_v23, %v1689_v11 }
 0x5b8   : > { %v1783_v25 = vsel %vm962_vm1, %v1782_v24, 0.0 }
 0x5b9   : > { %1784 = vadd.xlane.f32.xlu1 %v1783_v25 }
 0x5bb   : > { %v1780_v26 = vpop.f32.mrf.mxu1 }
 0x62c   : > { %v1785_v27 = vpop.xlane.xlu1 %1784 }
 0x62d   : > { %v1786_v28 = vmul.f32 %v1785_v27, %v1660_v50 }
 0x62f   : > { %v1787_v29 = vsub.f32 %v1782_v24, %v1786_v28 }
 0x631   : > { %v1788_v30 = vmul.f32 %v1787_v29, %v1787_v29 }
 0x633   : > { %v1789_v31 = vsel %vm962_vm1, %v1788_v30, 0.0 }
 0x634   : > { %1790 = vadd.xlane.f32.xlu2 %v1789_v31 }
 0x6a7   : > { %v1791_v32 = vpop.xlane.xlu2 %1790 }
 0x6a8   : > { %v1792_v33 = vmul.f32 %v1791_v32, %v1660_v50 }
 0x6aa   : > { %v1793_v34 = vadd.f32 1e-05, %v1792_v33 }
 0x6ac   : > { %2463 = vrsqrt.f32 %v1793_v34  ;;  %vm1800_vm13 = vweird.f32 %v1793_v34 }
 0x6b2   : > { %v2464_v35 = vpop.eup %2463 }
 0x6b3   : > { %v1795_v36 = vmul.f32 %v2464_v35, %v1793_v34  ;;  %vm1801_vm12 = vweird.f32 %v2464_v35 }
 0x6b4   : > { %vm1802_vm14 = vmor %vm1800_vm13, %vm1801_vm12 }
 0x6b5   : > { %v1796_v37 = vmul.f32 %v2464_v35, %v1795_v36 }
 0x6b7   : > { %v1797_v38 = vmul.f32 0.5, %v1796_v37 }
 0x6b9   : > { %v1798_v39 = vsub.f32 1.5, %v1797_v38 }
 0x6bb   : > { %v1799_v40 = vmul.f32 %v2464_v35, %v1798_v39 }
 0x6bd   : > { %v1803_v42 = vsel %vm1802_vm14, %v2464_v35, %v1799_v40 }
 0x6be   : > { %v1804_v44 = vmul.f32 %v1803_v42, %v1787_v29 }
 0x6c0   : > { %v1809_v45 = vmul.f32 %v2439_v41, %v1804_v44  ;;  %1819 = sbr.rel (%p2301_p1) target bundleno = 1735 (0x6c7), region = 96 }
 0x6c2   : > { %v1814_v46 = vadd.f32 %v2440_v43, %v1809_v45 }
 0x6c4   : > { %1815 = vst.msk [vmem:[#allocation2] sm:$0xff] %vm962_vm1, %v1814_v46 }
 0x6c5   : > { %1820 = vst.msk [vmem:[%s2849_s29] sm:$0xff] %vm962_vm1, %v1814_v46 }
 0x6c6   : > { %1821 = vst.msk [vmem:[%s2851_s27] sm:$0xff] %vm1290_vm2, %v2946_v4 }
 0x6c7 PF: > { %s3170_s1 = sld [smem:[#allocation13_spill]]  ;;  %s1840_s4 = sshll.u32 %s2849_s29, 4  ;;  %s1841_s4 = int_to_ptr.vmem [resolvable:$true] %s1840_s4 }
 0x6c8   : > { %s3171_s25 = sld [smem:[#allocation22_spill]] }
 0x6c9   : > { %s3173_s0 = sld [smem:[#allocation37_spill]] }
 0x6cd   : > { %s2304_s2 = sshll.u32 %s3170_s1, 3 }
 0x6ce   : > { %s1823_s5 = scalar_lea.sflag [#allocation4], %s3171_s25 }
 0x6cf   : > { %s3174_s23 = smov %s3173_s0  ;;  %s1838_s26 = scalar_lea.hbm %s3173_s0, %s2304_s2 }
 0x6d0   : > { %s1842_s28 = sshll.u32 %s1838_s26, 4  ;;  %s2485_s21 = scalar_lea.hbm %s3174_s23, 16  ;;  %s1843_s28 = int_to_ptr.hbm [resolvable:$true] %s1842_s28 }
 0x6d1   : > { %s2479_s20 = sshra.s32 %s1843_s28, 4  ;;  %s2480_s20 = int_to_ptr.hbm [resolvable:$true] %s2479_s20 }
 0x6d2   : > { %s2481_s16 = scalar_lea.hbm %s2480_s20, 8  ;;  %p2486_p6 = scmp.lt.s32.totalorder %s2480_s20, %s3174_s23 }
 0x6d3   : > { %p2482_p2 = scmp.ne.s32.totalorder %s2480_s20, %s2481_s16  ;;  %p2487_p7 = scmp.lt.s32.totalorder %s2485_s21, %s2481_s16 }
 0x6d5   : > { %p2483_p4 = pnand %p2482_p2, %p2739_p3  ;;  %p2488_p8 = por %p2487_p7, %p2486_p6 }
 0x6d7   : > { %p2484_p5 = pneg %p2483_p4 }
 0x6d9   : > { %p2489_p10 = pnand %p2488_p8, %p2484_p5 }
 0x6db   : > { %2492 = shalt.err (!%p2489_p10)
}
 0x6dc   : > { %2344 = dma.vmem_to_hbm [thread:$0]  (%p2739_p3), %s1841_s4, 128, %s1843_s28, %s1823_s5  }
 0x6dd   : > { %s3175_s17 = sld [smem:[#allocation38_spill]]  ;;  %s1854_s1 = sshll.u32 %s2851_s27, 4  ;;  %s1855_s1 = int_to_ptr.vmem [resolvable:$true] %s1854_s1 }
 0x6de   : > { %s1828_s6 = scalar_lea.sflag [#allocation6], %s3171_s25 }
 0x6e3   : > { %s1852_s19 = scalar_lea.hbm %s3175_s17, %s2304_s2  ;;  %s2513_s4 = scalar_lea.hbm %s3175_s17, 16 }
 0x6e4   : > { %s1856_s22 = sshll.u32 %s1852_s19, 4  ;;  %s1857_s22 = int_to_ptr.hbm [resolvable:$true] %s1856_s22 }
 0x6e5   : > { %s2507_s0 = sshra.s32 %s1857_s22, 4  ;;  %s2508_s0 = int_to_ptr.hbm [resolvable:$true] %s2507_s0 }
 0x6e6   : > { %s2509_s26 = scalar_lea.hbm %s2508_s0, 8  ;;  %p2514_p0 = scmp.lt.s32.totalorder %s2508_s0, %s3175_s17 }
 0x6e7   : > { %p2510_p11 = scmp.ne.s32.totalorder %s2508_s0, %s2509_s26  ;;  %p2515_p1 = scmp.lt.s32.totalorder %s2513_s4, %s2509_s26 }
 0x6e9   : > { %p2511_p12 = pnand %p2510_p11, %p2739_p3  ;;  %p2516_p2 = por %p2515_p1, %p2514_p0 }
 0x6eb   : > { %p2512_p13 = pneg %p2511_p12 }
 0x6ed   : > { %p2517_p4 = pnand %p2516_p2, %p2512_p13 }
 0x6ef   : > { %2520 = shalt.err (!%p2517_p4)
}
 0x6f0   : > { %2345 = dma.vmem_to_hbm [thread:$0]  (%p2739_p3), %s1855_s1, 128, %s1857_s22, %s1828_s6  }
 0x6f1 PF: > { %s3176_s27 = sld [smem:[#allocation16_spill]] }
 0x6f2   : > { %s3177_s25 = sld [smem:[#allocation9_spill]] }
 0x6f7   : > { %p2355_p5 = scmp.ge.s32.totalorder %s3176_s27, 2 }
 0x6f8   : > { %s1868_s24 = sand.u32 1, %s3177_s25  }
 0x6f9   : > { %p2349_p6 = pnand %p2355_p5, %p2749_p9  ;;  %s1869_s3 = scalar_lea.sflag [#allocation4], %s1868_s24 }
 0x6fb   : > { %p2350_p7 = pneg %p2349_p6 }
 0x6fd   : > { %2554 = dma.done.wait (%p2350_p7), %s1869_s3, 128  }
 0x6fe   : > { %2556 = vsyncadd (%p2350_p7), %s1869_s3, 4294967168  ;;  %s1879_s21 = scalar_lea.sflag [#allocation6], %s1868_s24 }
 0x6ff   : > { %2558 = dma.done.wait (%p2350_p7), %s1879_s21, 128  }
 0x700   : > { %2560 = vsyncadd (%p2350_p7), %s1879_s21, 4294967168  ;;  %s35_s20 = sadd.s32 1, %s3176_s27   ;;  %s3179_s27 = sld [smem:[#allocation10_spill]] }
 0x701   : > { %p32_p8 = scmp.ge.s32.totalorder %s35_s20, 6   ;;  %s3180_s28 = sld [smem:[#allocation11_spill]] }
 0x702   : > { %s3181_s29 = sld [smem:[#allocation21_spill]] }
 0x703   : > { %s3182_s30 = sld [smem:[#allocation14_spill]]  ;;  %34 = sbr.rel (!%p32_p8) target bundleno = 20 (0x14), region = 196 }
 0x704   : > { %s3183_s0 = sld [smem:[#allocation15_spill]] }
 0x705   : > { %s3184_s19 = sld [smem:[#allocation17_spill]] }
 0x706   : > { %s3185_s1 = sld [smem:[#allocation19_spill]] }
 0x708   :  { %1885 = vsyncpa [#allocation4], 1 }
 0x709   :  { %1887 = vsyncpa [#allocation4 + $0x1], 1 }
 0x70a   :  { %1888 = vsyncpa [#allocation6], 1 }
 0x70b   :  { %1890 = vsyncpa [#allocation6 + $0x1], 1 }

</bundles_post_ra>
